<compile_context>
chip_gen: v6e
topology: v6e:2x2x1
jax: 0.10.0
libtpu: 0.0.40
codegen_flags: <defaults>
</compile_context>

<pallas_src>
import math

import jax
import jax.numpy as jnp
from jax.experimental import pallas as pl
from jax.experimental.pallas import tpu as pltpu

# ---- configuration (small synthetic sizes consistent with the module) ----
DIM_IN = 3            # xyz positions
DIM_HIDDEN = 32       # net.dim_hidden
DIM_OUT = 7           # 4 quaternion + 3 scale  (qs[:, :4] / qs[:, 4:])
DIM_OUT_PAD = 8       # padded to a full sublane tile for an unmasked store
NUM_LAYERS = 4        # net.num_layers
LATENT_DIM = 8        # latent_dim (divisible by 4)
W0 = 1.0
W0_INITIAL = 30.0
N = 128               # number of query positions
TN = 128              # lane tile over query positions


# ---------------------------------------------------------------------------
# Fused SIREN kernel, transposed (feature-on-sublane, N-on-lane) layout.
#   x_ref: [DIM_IN, TN]
#   then (w, b) pairs: NUM_LAYERS sine layers ([h, in], [h, 1]) with the sine
#   frequency pre-folded, followed by the final linear layer whose weights
#   already absorb the quaternion rotation and are zero-padded to 8 rows
#   ([8, h], [8, 1]).
#   out_ref: [DIM_OUT_PAD, TN]
# ---------------------------------------------------------------------------
def siren_kernel(x_ref, *refs):
    n_pairs = NUM_LAYERS + 1
    params = refs[: 2 * n_pairs]
    out_ref = refs[2 * n_pairs]

    x = x_ref[...]                                        # [DIM_IN, TN]

    # SIREN sine layers: sin(W' x + b')  (w0 already folded into W', b').
    for i in range(NUM_LAYERS):
        w = params[2 * i][...]
        b = params[2 * i + 1][...]
        x = jnp.sin(jnp.dot(w, x, preferred_element_type=jnp.float32) + b)

    # Last layer (linear); quaternion rotation folded in, padded to 8 rows so
    # the store is a full, unmasked (8, 128) tile.
    wl = params[2 * NUM_LAYERS][...]
    bl = params[2 * NUM_LAYERS + 1][...]
    out_ref[...] = jnp.dot(wl, x, preferred_element_type=jnp.float32) + bl


# ---------------------------------------------------------------------------
# Parameter construction (deterministic, SIREN-style / PyTorch-default-style
# uniform init; conv4 is explicitly zero as in __init__).  All weights are
# stored [in_features, out_features]; the wrapper transposes for the kernel.
# ---------------------------------------------------------------------------
def init_params(key):
    keys = iter(jax.random.split(key, 64))

    def uniform(k, shape, bound):
        return jax.random.uniform(k, shape, jnp.float32, -bound, bound)

    siren = []
    b0 = 1.0 / DIM_IN
    siren.append((uniform(next(keys), (DIM_IN, DIM_HIDDEN), b0),
                  uniform(next(keys), (1, DIM_HIDDEN), b0)))
    bh = math.sqrt(6.0 / DIM_HIDDEN) / W0
    for _ in range(NUM_LAYERS - 1):
        siren.append((uniform(next(keys), (DIM_HIDDEN, DIM_HIDDEN), bh),
                      uniform(next(keys), (1, DIM_HIDDEN), bh)))
    siren.append((uniform(next(keys), (DIM_HIDDEN, DIM_OUT), bh),
                  uniform(next(keys), (1, DIM_OUT), bh)))

    # Modulator parameters exist in the module (__init__) but its forward
    # output is discarded (net is called with mods=None) -> never evaluated.
    mod = []
    for ind in range(NUM_LAYERS):
        dim = LATENT_DIM if ind == 0 else DIM_HIDDEN + LATENT_DIM
        bnd = 1.0 / math.sqrt(dim)
        mod.append((uniform(next(keys), (dim, DIM_HIDDEN), bnd),
                    uniform(next(keys), (1, DIM_HIDDEN), bnd)))

    conv = []
    for (ci, co) in [(LATENT_DIM, LATENT_DIM),
                     (LATENT_DIM, LATENT_DIM // 2),
                     (LATENT_DIM // 2, LATENT_DIM // 4)]:
        bnd = 1.0 / math.sqrt(ci)
        conv.append((uniform(next(keys), (ci, co), bnd),
                     uniform(next(keys), (1, co), bnd)))
    # rotaion_conv4: weight and bias are zeros by construction
    conv.append((jnp.zeros((LATENT_DIM // 4, 4), jnp.float32),
                 jnp.zeros((1, 4), jnp.float32)))
    return siren, mod, conv


# ---------------------------------------------------------------------------
# Wrapper: rotation path + frequency/quaternion folds in plain JAX, then one
# pallas_call over a lane-tiled grid of query positions.
# ---------------------------------------------------------------------------
@jax.jit
def transformation_forward(pos, latent, siren_params, mod_params, conv_params):
    # Modulator output is discarded in the PyTorch forward (mods=None) -> skip.
    del mod_params

    # global_rotaion_forward: Conv1d(k=1) on a [C,1] tensor == matvec.
    z = latent.reshape(1, LATENT_DIM)
    y = z
    for (w, b) in conv_params[:3]:
        y = y @ w + b
    w4, b4 = conv_params[3]
    rot = jnp.tanh(y @ w4 + b4) + jnp.array([[1.0, 0.0, 0.0, 0.0]], jnp.float32)

    # Hamilton product (real-first) q_out = rot (x) q is linear in q:
    # q_out_row = q_row @ M(rot).  Extend to blockdiag(M, I3), pad to 8 output
    # columns, and fold into the last SIREN layer.
    rw, rx, ry, rz = rot[0, 0], rot[0, 1], rot[0, 2], rot[0, 3]
    M = jnp.stack([
        jnp.stack([rw,  rx,  ry,  rz]),
        jnp.stack([-rx, rw,  rz, -ry]),
        jnp.stack([-ry, -rz, rw,  rx]),
        jnp.stack([-rz, ry, -rx,  rw]),
    ])                                                    # [4, 4]
    M7 = jnp.zeros((DIM_OUT, DIM_OUT_PAD), jnp.float32)
    M7 = M7.at[:4, :4].set(M)
    M7 = M7.at[4:DIM_OUT, 4:DIM_OUT].set(jnp.eye(DIM_OUT - 4, dtype=jnp.float32))

    w_last, b_last = siren_params[NUM_LAYERS]             # [32,7], [1,7]
    wl_fold = (w_last @ M7).T                             # [8, 32]
    bl_fold = (b_last @ M7).T                             # [8, 1]

    # Transposed, lane-dense kernel layout; sine frequencies folded in.
    kernel_args = [pos.T]                                 # [DIM_IN, N]
    in_specs = [pl.BlockSpec((DIM_IN, TN), lambda i: (0, i))]
    for li, (w, b) in enumerate(siren_params[:NUM_LAYERS]):
        w0 = W0_INITIAL if li == 0 else W0
        kernel_args += [(w0 * w).T, (w0 * b).T]           # [out,in], [out,1]
    kernel_args += [wl_fold, bl_fold]                     # [8,32], [8,1]
    for a in kernel_args[1:]:
        in_specs.append(pl.BlockSpec(a.shape, lambda i: (0, 0)))

    n_pos = pos.shape[0]
    grid = (pl.cdiv(n_pos, TN),)

    flops = 2 * n_pos * (DIM_IN * DIM_HIDDEN
                         + (NUM_LAYERS - 1) * DIM_HIDDEN * DIM_HIDDEN
                         + DIM_HIDDEN * DIM_OUT_PAD)
    bytes_accessed = 4 * (n_pos * (DIM_IN + DIM_OUT_PAD)
                          + sum(int(a.size) for a in kernel_args[1:]))

    out_t = pl.pallas_call(
        siren_kernel,
        out_shape=jax.ShapeDtypeStruct((DIM_OUT_PAD, n_pos), jnp.float32),
        grid_spec=pltpu.PrefetchScalarGridSpec(
            num_scalar_prefetch=0,
            grid=grid,
            in_specs=in_specs,
            out_specs=pl.BlockSpec((DIM_OUT_PAD, TN), lambda i: (0, i)),
        ),
        compiler_params=pltpu.CompilerParams(
            dimension_semantics=("parallel",)),
        cost_estimate=pl.CostEstimate(
            flops=flops,
            transcendentals=n_pos * DIM_HIDDEN * NUM_LAYERS,
            bytes_accessed=bytes_accessed),
    )(*kernel_args)                                       # [8, N]
    return out_t[:DIM_OUT].T                              # [N, DIM_OUT]


# ---------------------------------------------------------------------------
# Pure-JAX reference for correctness checking (explicit quaternion multiply,
# faithful to the PyTorch forward).
# ---------------------------------------------------------------------------
def reference_forward(pos, latent, siren_params, mod_params, conv_params):
    del mod_params
    w, b = siren_params[0]
    x = jnp.sin(W0_INITIAL * (pos @ w + b))
    for (w, b) in siren_params[1:NUM_LAYERS]:
        x = jnp.sin(W0 * (x @ w + b))
    wl, bl = siren_params[NUM_LAYERS]
    qs = x @ wl + bl

    y = latent.reshape(1, -1)
    for (w, b) in conv_params[:3]:
        y = y @ w + b
    w4, b4 = conv_params[3]
    rot = jnp.tanh(y @ w4 + b4) + jnp.array([[1.0, 0.0, 0.0, 0.0]])
    rw, rx, ry, rz = rot[0, 0], rot[0, 1], rot[0, 2], rot[0, 3]
    qw, qx, qy, qz = qs[:, 0], qs[:, 1], qs[:, 2], qs[:, 3]
    q = jnp.stack([rw * qw - rx * qx - ry * qy - rz * qz,
                   rw * qx + rx * qw + ry * qz - rz * qy,
                   rw * qy - rx * qz + ry * qw + rz * qx,
                   rw * qz + rx * qy - ry * qx + rz * qw], axis=1)
    return jnp.concatenate([q, qs[:, 4:]], axis=1)


if __name__ == "__main__":
    key = jax.random.PRNGKey(0)
    k_pos, k_lat, k_par = jax.random.split(key, 3)
    pos = jax.random.normal(k_pos, (N, DIM_IN), jnp.float32)
    latent = jax.random.normal(k_lat, (LATENT_DIM,), jnp.float32)
    siren_p, mod_p, conv_p = init_params(k_par)

    out = transformation_forward(pos, latent, siren_p, mod_p, conv_p)
    out = jax.block_until_ready(out)

    ref = reference_forward(pos, latent, siren_p, mod_p, conv_p)
    assert out.shape == (N, DIM_OUT)
    assert jnp.allclose(out, ref, rtol=5e-4, atol=5e-4), \
        float(jnp.max(jnp.abs(out - ref)))
    print("KERNEL_OK")
</pallas_src>

<mosaic_0001>
module attributes {stable_mosaic.version = 11 : i64} {
  func.func @siren_kernel(%arg0: i32, %arg1: memref<3x128xf32, #tpu.memory_space<vmem>>, %arg2: memref<32x3xf32, #tpu.memory_space<vmem>>, %arg3: memref<32x1xf32, #tpu.memory_space<vmem>>, %arg4: memref<32x32xf32, #tpu.memory_space<vmem>>, %arg5: memref<32x1xf32, #tpu.memory_space<vmem>>, %arg6: memref<32x32xf32, #tpu.memory_space<vmem>>, %arg7: memref<32x1xf32, #tpu.memory_space<vmem>>, %arg8: memref<32x32xf32, #tpu.memory_space<vmem>>, %arg9: memref<32x1xf32, #tpu.memory_space<vmem>>, %arg10: memref<8x32xf32, #tpu.memory_space<vmem>>, %arg11: memref<8x1xf32, #tpu.memory_space<vmem>>, %arg12: memref<8x128xf32, #tpu.memory_space<vmem>>) attributes {dimension_semantics = [#tpu.dimension_semantics<parallel>], iteration_bounds = array<i64: 1>, scalar_prefetch = 0 : i64, scratch_operands = 0 : i64, tpu.core_type = #tpu.core_type<tc>, window_params = [{transform_indices = @transform_0, window_bounds = array<i64: 3, 128>}, {pipeline_mode = #tpu.pipeline_mode<synchronous>, transform_indices = @transform_1, window_bounds = array<i64: 32, 3>}, {pipeline_mode = #tpu.pipeline_mode<synchronous>, transform_indices = @transform_2, window_bounds = array<i64: 32, 1>}, {pipeline_mode = #tpu.pipeline_mode<synchronous>, transform_indices = @transform_3, window_bounds = array<i64: 32, 32>}, {pipeline_mode = #tpu.pipeline_mode<synchronous>, transform_indices = @transform_4, window_bounds = array<i64: 32, 1>}, {pipeline_mode = #tpu.pipeline_mode<synchronous>, transform_indices = @transform_5, window_bounds = array<i64: 32, 32>}, {pipeline_mode = #tpu.pipeline_mode<synchronous>, transform_indices = @transform_6, window_bounds = array<i64: 32, 1>}, {pipeline_mode = #tpu.pipeline_mode<synchronous>, transform_indices = @transform_7, window_bounds = array<i64: 32, 32>}, {pipeline_mode = #tpu.pipeline_mode<synchronous>, transform_indices = @transform_8, window_bounds = array<i64: 32, 1>}, {pipeline_mode = #tpu.pipeline_mode<synchronous>, transform_indices = @transform_9, window_bounds = array<i64: 8, 32>}, {pipeline_mode = #tpu.pipeline_mode<synchronous>, transform_indices = @transform_10, window_bounds = array<i64: 8, 1>}, {transform_indices = @transform_11, window_bounds = array<i64: 8, 128>}]} {
    %c0 = arith.constant 0 : index
    %c0_0 = arith.constant 0 : index
    %0 = vector.load %arg1[%c0, %c0_0] : memref<3x128xf32, #tpu.memory_space<vmem>>, vector<3x128xf32>
    %c0_1 = arith.constant 0 : index
    %c0_2 = arith.constant 0 : index
    %1 = vector.load %arg2[%c0_1, %c0_2] : memref<32x3xf32, #tpu.memory_space<vmem>>, vector<32x3xf32>
    %c0_3 = arith.constant 0 : index
    %c0_4 = arith.constant 0 : index
    %2 = vector.load %arg3[%c0_3, %c0_4] : memref<32x1xf32, #tpu.memory_space<vmem>>, vector<32x1xf32>
    %cst = arith.constant dense<0.000000e+00> : vector<32x128xf32>
    %3 = tpu.matmul %1, %0, %cst {dimension_numbers = #tpu.dot_dimension_numbers<[1], [0], [0], [1], [0, 0, 1, 1], [], []>} : vector<32x3xf32>, vector<3x128xf32>, vector<32x128xf32> -> vector<32x128xf32>
    %4 = vector.broadcast %2 : vector<32x1xf32> to vector<32x128xf32>
    %5 = arith.addf %3, %4 : vector<32x128xf32>
    %6 = math.sin %5 : vector<32x128xf32>
    %c0_5 = arith.constant 0 : index
    %c0_6 = arith.constant 0 : index
    %7 = vector.load %arg4[%c0_5, %c0_6] : memref<32x32xf32, #tpu.memory_space<vmem>>, vector<32x32xf32>
    %c0_7 = arith.constant 0 : index
    %c0_8 = arith.constant 0 : index
    %8 = vector.load %arg5[%c0_7, %c0_8] : memref<32x1xf32, #tpu.memory_space<vmem>>, vector<32x1xf32>
    %cst_9 = arith.constant dense<0.000000e+00> : vector<32x128xf32>
    %9 = tpu.matmul %7, %6, %cst_9 {dimension_numbers = #tpu.dot_dimension_numbers<[1], [0], [0], [1], [0, 0, 1, 1], [], []>} : vector<32x32xf32>, vector<32x128xf32>, vector<32x128xf32> -> vector<32x128xf32>
    %10 = vector.broadcast %8 : vector<32x1xf32> to vector<32x128xf32>
    %11 = arith.addf %9, %10 : vector<32x128xf32>
    %12 = math.sin %11 : vector<32x128xf32>
    %c0_10 = arith.constant 0 : index
    %c0_11 = arith.constant 0 : index
    %13 = vector.load %arg6[%c0_10, %c0_11] : memref<32x32xf32, #tpu.memory_space<vmem>>, vector<32x32xf32>
    %c0_12 = arith.constant 0 : index
    %c0_13 = arith.constant 0 : index
    %14 = vector.load %arg7[%c0_12, %c0_13] : memref<32x1xf32, #tpu.memory_space<vmem>>, vector<32x1xf32>
    %cst_14 = arith.constant dense<0.000000e+00> : vector<32x128xf32>
    %15 = tpu.matmul %13, %12, %cst_14 {dimension_numbers = #tpu.dot_dimension_numbers<[1], [0], [0], [1], [0, 0, 1, 1], [], []>} : vector<32x32xf32>, vector<32x128xf32>, vector<32x128xf32> -> vector<32x128xf32>
    %16 = vector.broadcast %14 : vector<32x1xf32> to vector<32x128xf32>
    %17 = arith.addf %15, %16 : vector<32x128xf32>
    %18 = math.sin %17 : vector<32x128xf32>
    %c0_15 = arith.constant 0 : index
    %c0_16 = arith.constant 0 : index
    %19 = vector.load %arg8[%c0_15, %c0_16] : memref<32x32xf32, #tpu.memory_space<vmem>>, vector<32x32xf32>
    %c0_17 = arith.constant 0 : index
    %c0_18 = arith.constant 0 : index
    %20 = vector.load %arg9[%c0_17, %c0_18] : memref<32x1xf32, #tpu.memory_space<vmem>>, vector<32x1xf32>
    %cst_19 = arith.constant dense<0.000000e+00> : vector<32x128xf32>
    %21 = tpu.matmul %19, %18, %cst_19 {dimension_numbers = #tpu.dot_dimension_numbers<[1], [0], [0], [1], [0, 0, 1, 1], [], []>} : vector<32x32xf32>, vector<32x128xf32>, vector<32x128xf32> -> vector<32x128xf32>
    %22 = vector.broadcast %20 : vector<32x1xf32> to vector<32x128xf32>
    %23 = arith.addf %21, %22 : vector<32x128xf32>
    %24 = math.sin %23 : vector<32x128xf32>
    %c0_20 = arith.constant 0 : index
    %c0_21 = arith.constant 0 : index
    %25 = vector.load %arg10[%c0_20, %c0_21] : memref<8x32xf32, #tpu.memory_space<vmem>>, vector<8x32xf32>
    %c0_22 = arith.constant 0 : index
    %c0_23 = arith.constant 0 : index
    %26 = vector.load %arg11[%c0_22, %c0_23] : memref<8x1xf32, #tpu.memory_space<vmem>>, vector<8x1xf32>
    %cst_24 = arith.constant dense<0.000000e+00> : vector<8x128xf32>
    %27 = tpu.matmul %25, %24, %cst_24 {dimension_numbers = #tpu.dot_dimension_numbers<[1], [0], [0], [1], [0, 0, 1, 1], [], []>} : vector<8x32xf32>, vector<32x128xf32>, vector<8x128xf32> -> vector<8x128xf32>
    %28 = vector.broadcast %26 : vector<8x1xf32> to vector<8x128xf32>
    %29 = arith.addf %27, %28 : vector<8x128xf32>
    %c0_25 = arith.constant 0 : index
    %c0_26 = arith.constant 0 : index
    %30 = vector.load %arg12[%c0_25, %c0_26] : memref<8x128xf32, #tpu.memory_space<vmem>>, vector<8x128xf32>
    tpu.vector_store %arg12[%c0_25, %c0_26], %29 {strides = array<i32>} : memref<8x128xf32, #tpu.memory_space<vmem>>, vector<8x128xf32>,
    return
  }
  func.func @transform_0(%arg0: i32) -> (i32, i32) {
    %c0_i32 = arith.constant 0 : i32
    %c0_i32_0 = arith.constant 0 : i32
    return %c0_i32, %arg0 : i32, i32
  }
  func.func @transform_1(%arg0: i32) -> (i32, i32) {
    %c0_i32 = arith.constant 0 : i32
    %c0_i32_0 = arith.constant 0 : i32
    %c0_i32_1 = arith.constant 0 : i32
    return %c0_i32, %c0_i32_0 : i32, i32
  }
  func.func @transform_2(%arg0: i32) -> (i32, i32) {
    %c0_i32 = arith.constant 0 : i32
    %c0_i32_0 = arith.constant 0 : i32
    %c0_i32_1 = arith.constant 0 : i32
    return %c0_i32, %c0_i32_0 : i32, i32
  }
  func.func @transform_3(%arg0: i32) -> (i32, i32) {
    %c0_i32 = arith.constant 0 : i32
    %c0_i32_0 = arith.constant 0 : i32
    %c0_i32_1 = arith.constant 0 : i32
    return %c0_i32, %c0_i32_0 : i32, i32
  }
  func.func @transform_4(%arg0: i32) -> (i32, i32) {
    %c0_i32 = arith.constant 0 : i32
    %c0_i32_0 = arith.constant 0 : i32
    %c0_i32_1 = arith.constant 0 : i32
    return %c0_i32, %c0_i32_0 : i32, i32
  }
  func.func @transform_5(%arg0: i32) -> (i32, i32) {
    %c0_i32 = arith.constant 0 : i32
    %c0_i32_0 = arith.constant 0 : i32
    %c0_i32_1 = arith.constant 0 : i32
    return %c0_i32, %c0_i32_0 : i32, i32
  }
  func.func @transform_6(%arg0: i32) -> (i32, i32) {
    %c0_i32 = arith.constant 0 : i32
    %c0_i32_0 = arith.constant 0 : i32
    %c0_i32_1 = arith.constant 0 : i32
    return %c0_i32, %c0_i32_0 : i32, i32
  }
  func.func @transform_7(%arg0: i32) -> (i32, i32) {
    %c0_i32 = arith.constant 0 : i32
    %c0_i32_0 = arith.constant 0 : i32
    %c0_i32_1 = arith.constant 0 : i32
    return %c0_i32, %c0_i32_0 : i32, i32
  }
  func.func @transform_8(%arg0: i32) -> (i32, i32) {
    %c0_i32 = arith.constant 0 : i32
    %c0_i32_0 = arith.constant 0 : i32
    %c0_i32_1 = arith.constant 0 : i32
    return %c0_i32, %c0_i32_0 : i32, i32
  }
  func.func @transform_9(%arg0: i32) -> (i32, i32) {
    %c0_i32 = arith.constant 0 : i32
    %c0_i32_0 = arith.constant 0 : i32
    %c0_i32_1 = arith.constant 0 : i32
    return %c0_i32, %c0_i32_0 : i32, i32
  }
  func.func @transform_10(%arg0: i32) -> (i32, i32) {
    %c0_i32 = arith.constant 0 : i32
    %c0_i32_0 = arith.constant 0 : i32
    %c0_i32_1 = arith.constant 0 : i32
    return %c0_i32, %c0_i32_0 : i32, i32
  }
  func.func @transform_11(%arg0: i32) -> (i32, i32) {
    %c0_i32 = arith.constant 0 : i32
    %c0_i32_0 = arith.constant 0 : i32
    return %c0_i32, %arg0 : i32, i32
  }
}

</mosaic_0001>

<bundles_post_ra>
// kernel: transformation_forward.1
= control target key start
LH: loop header
LB: loop body
LE: loop exit
PB: predicated region body
PF: predicated region fallthrough
CT: control target
= control target key end

     0   :  { %vm80_vm0 = vcmask 1042432   ;;  %vm67_vm1 = vcmask 23552   ;;  %v2610_v3 = vmov 0   ;;  %v2611_v59 = vmov 683565275   ;;  %s3833_s0 = inlined_call_operand.vmem [shape: f32[3,128], index: 0, kind: input, shape index: {}]   ;;  %s3834_s1 = inlined_call_operand.vmem [shape: f32[32,3], index: 1, kind: input, shape index: {}]   ;;  %s3835_s2 = inlined_call_operand.vmem [shape: f32[32,1], index: 2, kind: input, shape index: {}]   ;;  %s3836_s4 = inlined_call_operand.vmem [shape: f32[32,1], index: 4, kind: input, shape index: {}]   ;;  %s3837_s6 = inlined_call_operand.vmem [shape: f32[32,1], index: 6, kind: input, shape index: {}]   ;;  %s3838_s8 = inlined_call_operand.vmem [shape: f32[32,1], index: 8, kind: input, shape index: {}]   ;;  %s3839_s10 = inlined_call_operand.vmem [shape: f32[8,1], index: 10, kind: input, shape index: {}]   ;;  %s3840_s3 = inlined_call_operand.vmem [shape: f32[32,32], index: 3, kind: input, shape index: {}]   ;;  %s3841_s5 = inlined_call_operand.vmem [shape: f32[32,32], index: 5, kind: input, shape index: {}]   ;;  %s3842_s7 = inlined_call_operand.vmem [shape: f32[32,32], index: 7, kind: input, shape index: {}]   ;;  %s3843_s9 = inlined_call_operand.vmem [shape: f32[8,32], index: 9, kind: input, shape index: {}]   ;;  %s3844_s11 = inlined_call_operand.vmem [shape: f32[8,128], index: 11, kind: output, shape index: {}]  }
   0x1   :  { %v38_v0 = vld [vmem:[%s3833_s0] sm:$0x7]  ;;  %v40_v2 = vld [vmem:[%s3834_s1 + $0x8] sm:$0xff]  ;;  %2544 = vset.pattern.permute.xlu0 %v2610_v3  ;;  %2545 = vset.pattern.permute.xlu1 %v2610_v3  ;;  %v41_v4 = vld [vmem:[%s3834_s1 + $0x10] sm:$0xff]  ;;  %v2612_v62 = vmov 2475754826  }
   0x2   :  { %v39_v1 = vld [vmem:[%s3834_s1] sm:$0xff]  ;;  %2410 = vmatprep.subr.msk.mxu0 %vm80_vm0, %v38_v0  ;;  %v46_v5 = vld [vmem:[%s3835_s2 + $0x18] sm:$0xff]  ;;  %v44_v6 = vld [vmem:[%s3835_s2 + $0x8] sm:$0xff] }
   0x3   :  { %2412 = vmatprep.mubr.msk.f32.mxu0 %vm67_vm1, %v39_v1  ;;  %2411 = vmatpush3.msk.msra.mxu0 %vm80_vm0, %v38_v0  ;;  %v45_v7 = vld [vmem:[%s3835_s2 + $0x10] sm:$0xff]  ;;  %v42_v8 = vld [vmem:[%s3834_s1 + $0x18] sm:$0xff]  ;;  %v43_v9 = vld [vmem:[%s3835_s2] sm:$0xff]  ;;  %v2613_v0 = vmov 2131351028  }
   0x4   :  { %64 = vperm.xlu0 %2544, %v46_v5   ;;  %2413 = vmatmul.mubr.msk.f32.vlgmr.msra.gmra.mxu0 %vm67_vm1, %v40_v2  ;;  %v592_v10 = vld [vmem:[%s3836_s4 + $0x18] sm:$0xff]  ;;  %v591_v11 = vld [vmem:[%s3836_s4 + $0x10] sm:$0xff]  ;;  %v590_v12 = vld [vmem:[%s3836_s4 + $0x8] sm:$0xff]  ;;  %v2614_v2 = vmov 2102212464  }
   0x5   :  { %54 = vperm.xlu1 %2545, %v44_v6   ;;  %2415 = vmatprep.mubr.msk.f32.mxu0 %vm67_vm1, %v41_v4  ;;  %v589_v13 = vld [vmem:[%s3836_s4] sm:$0xff]  ;;  %v1134_v14 = vld [vmem:[%s3837_s6 + $0x18] sm:$0xff]  ;;  %v1133_v15 = vld [vmem:[%s3837_s6 + $0x10] sm:$0xff]  ;;  %v2615_v4 = vmov 920167782  }
   0x6   :  { %v1132_v16 = vld [vmem:[%s3837_s6 + $0x8] sm:$0xff]  ;;  %v1131_v17 = vld [vmem:[%s3837_s6] sm:$0xff]  ;;  %v1675_v18 = vld [vmem:[%s3838_s8 + $0x18] sm:$0xff] }
   0x7   :  { %v1674_v19 = vld [vmem:[%s3838_s8 + $0x10] sm:$0xff]  ;;  %v1673_v20 = vld [vmem:[%s3838_s8 + $0x8] sm:$0xff]  ;;  %v1672_v21 = vld [vmem:[%s3838_s8] sm:$0xff] }
   0x8   :  { %59 = vperm.xlu0 %2544, %v45_v7   ;;  %2416 = vmatmul.mubr.msk.f32.gmra.mxu0 %vm67_vm1, %v42_v8  ;;  %v2210_v22 = vld [vmem:[%s3839_s10] sm:$0xff] }
   0x9   :  { %49 = vperm.xlu1 %2545, %v43_v9  }
   0xc   :  { %610 = vperm.xlu0 %2544, %v592_v10  }
   0xd   :  { %605 = vperm.xlu1 %2545, %v591_v11   ;;  %v2616_v11 = vmov 1326507024  }
  0x10   :  { %600 = vperm.xlu0 %2544, %v590_v12  }
  0x11   :  { %595 = vperm.xlu1 %2545, %v589_v13  }
  0x14   :  { %1152 = vperm.xlu0 %2544, %v1134_v14  }
  0x15   :  { %1147 = vperm.xlu1 %2545, %v1133_v15  }
  0x18   :  { %1142 = vperm.xlu0 %2544, %v1132_v16  }
  0x19   :  { %1137 = vperm.xlu1 %2545, %v1131_v17  }
  0x1c   :  { %1693 = vperm.xlu0 %2544, %v1675_v18  }
  0x1d   :  { %1688 = vperm.xlu1 %2545, %v1674_v19  }
  0x20   :  { %1683 = vperm.xlu0 %2544, %v1673_v20  }
  0x21   :  { %1678 = vperm.xlu1 %2545, %v1672_v21  }
  0x24   :  { %2213 = vperm.xlu0 %2544, %v2210_v22  }
  0x7f   :  { %v65_v24 = vpop.permute.xlu0 %64 }
  0x80   :  { %v55_v23 = vpop.permute.xlu1 %54 }
  0x83   :  { %v60_v35 = vpop.permute.xlu0 %59 }
  0x84   :  { %v50_v27 = vpop.permute.xlu1 %49 }
  0xc4   :  { %v2414_v25 = vpop.f32.mrf.mxu0 }
  0xc5   :  { %v2749_v26 = vadd.f32 %v2414_v25, %v55_v23 }
  0xc6   :  { %v150_v28 = vpop.f32.mrf.mxu0 }
  0xc7   :  { %v273_v29 = vand.u32 2147483647, %v2749_v26  ;;  %v276_v30 = vand.u32 2139095040, %v2749_v26  ;;  %v2753_v31 = vadd.f32 %v150_v28, %v50_v27 }
  0xc8   :  { %v2417_v32 = vpop.f32.mrf.mxu0 }
  0xc9   :  { %v277_v33 = vshrl.u32 %v276_v30, 23  ;;  %v169_v34 = vand.u32 2147483647, %v2753_v31  ;;  %v280_v36 = vand.u32 8388607, %v273_v29  ;;  %v172_v37 = vand.u32 2139095040, %v2753_v31 }
  0xca   :  { %v2759_v38 = vadd.f32 %v2417_v32, %v65_v24  ;;  %v160_v39 = vpop.f32.mrf.mxu0 }
  0xcb   :  { %v2303_v40 = vadd.s32 4294967169, %v277_v33  ;;  %v176_v41 = vand.u32 8388607, %v169_v34  ;;  %v2763_v42 = vadd.f32 %v160_v39, %v60_v35  ;;  %v173_v43 = vshrl.u32 %v172_v37, 23 }
  0xcc   :  { %v484_v44 = vand.u32 2139095040, %v2759_v38  ;;  %v281_v46 = vor.u32 8388608, %v280_v36 }
  0xcd   :  { %v283_v45 = vadd.s32 1, %v2303_v40  ;;  %v2299_v47 = vadd.s32 4294967169, %v173_v43  ;;  %v177_v48 = vor.u32 8388608, %v176_v41  ;;  %v380_v50 = vand.u32 2139095040, %v2763_v42 }
  0xce   :  { %v485_v49 = vshrl.u32 %v484_v44, 23  ;;  %v2767_v55 = vshll.u32 %v281_v46, 8 }
  0xcf   :  { %vm284_vm2 = vcmp.gt.s32.totalorder %v283_v45, 0  ;;  %v179_v52 = vadd.s32 1, %v2299_v47  ;;  %v2769_v56 = vshll.u32 %v177_v48, 8  ;;  %v2772_v61 = vshrl.u32 %v380_v50, 23 }
  0xd0   :  { %v285_v51 = vsel %vm284_vm2, %v283_v45, 0  ;;  %v2311_v57 = vadd.s32 4294967169, %v485_v49 }
  0xd1   :  { %v286_v53 = vshrl.u32 %v285_v51, 5  ;;  %v287_v54 = vand.u32 31, %v285_v51  ;;  %vm180_vm3 = vcmp.gt.s32.totalorder %v179_v52, 0 }
  0xd2   :  { %v181_v16 = vsel %vm180_vm3, %v179_v52, 0  ;;  %v491_v33 = vadd.s32 1, %v2311_v57 }
  0xd3   :  { %v288_v58 = vsub.s32 32, %v287_v54  ;;  %v290_v60 = vshll.u32 %v2611_v59, %v287_v54  ;;  %v293_v63 = vshll.u32 %v2612_v62, %v287_v54  ;;  %v296_v1 = vshll.u32 %v2613_v0, %v287_v54 }
  0xd4   :  { %v299_v3 = vshll.u32 %v2614_v2, %v287_v54  ;;  %v302_v5 = vshll.u32 %v2615_v4, %v287_v54  ;;  %vm305_vm4 = vcmp.lt.s32.totalorder %v286_v53, 1  ;;  %vm307_vm5 = vcmp.lt.s32.totalorder %v286_v53, 3 }
  0xd5   :  { %v291_v6 = vshrl.u32 %v2612_v62, %v288_v58  ;;  %v294_v7 = vshrl.u32 %v2613_v0, %v288_v58  ;;  %v297_v8 = vshrl.u32 %v2614_v2, %v288_v58  ;;  %v289_v9 = vshrl.u32 %v2611_v59, %v288_v58 }
  0xd6   :  { %v300_v10 = vshrl.u32 %v2615_v4, %v288_v58  ;;  %v303_v12 = vshrl.u32 %v2616_v11, %v288_v58  ;;  %vm308_vm6 = vcmp.lt.s32.totalorder %v286_v53, 4  ;;  %v183_v19 = vand.u32 31, %v181_v16 }
  0xd7   :  { %v292_v13 = vor.u32 %v291_v6, %v290_v60  ;;  %v295_v14 = vor.u32 %v294_v7, %v293_v63  ;;  %v298_v15 = vor.u32 %v297_v8, %v296_v1  ;;  %vm306_vm7 = vcmp.lt.s32.totalorder %v286_v53, 2 }
  0xd8   :  { %v301_v17 = vor.u32 %v300_v10, %v299_v3  ;;  %v304_v18 = vor.u32 %v303_v12, %v302_v5  ;;  %v184_v28 = vsub.s32 32, %v183_v19  ;;  %v182_v39 = vshrl.u32 %v181_v16, 5 }
  0xd9   :  { %v309_v20 = vsel %vm305_vm4, %v289_v9, %v292_v13  ;;  %v310_v21 = vsel %vm308_vm6, %v298_v15, 2102212464  ;;  %v313_v22 = vsel %vm305_vm4, %v292_v13, %v295_v14  ;;  %v317_v23 = vsel %vm305_vm4, %v295_v14, %v298_v15 }
  0xda   :  { %v311_v24 = vsel %vm307_vm5, %v295_v14, %v310_v21  ;;  %v314_v25 = vsel %vm308_vm6, %v301_v17, 920167782  ;;  %v318_v27 = vsel %vm308_vm6, %v304_v18, 1326507024  ;;  %v186_v45 = vshll.u32 %v2611_v59, %v183_v19 }
  0xdb   :  { %v315_v30 = vsel %vm307_vm5, %v298_v15, %v314_v25  ;;  %v319_v32 = vsel %vm307_vm5, %v301_v17, %v318_v27  ;;  %v312_v35 = vsel %vm306_vm7, %v309_v20, %v311_v24  ;;  %v187_v46 = vshrl.u32 %v2612_v62, %v184_v28 }
  0xdc   :  { %v316_v36 = vsel %vm306_vm7, %v313_v22, %v315_v30  ;;  %v320_v37 = vsel %vm306_vm7, %v317_v23, %v319_v32  ;;  %v189_v47 = vshll.u32 %v2612_v62, %v183_v19  ;;  %v190_v48 = vshrl.u32 %v2613_v0, %v184_v28 }
  0xdd   :  { %v2792_v40 = vmul.u32.u64.low %v2767_v55, %v320_v37  ;;  %v2793_v41 = vmul.u32.u64.high %v2767_v55, %v320_v37, %v2792_v40  ;;  %v2796_v43 = vmul.u32.u64.low %v2767_v55, %v316_v36  ;;  %v2797_v44 = vmul.u32.u64.high %v2767_v55, %v316_v36, %v2796_v43 }
  0xde   :  { %v192_v49 = vshll.u32 %v2613_v0, %v183_v19  ;;  %v193_v50 = vshrl.u32 %v2614_v2, %v184_v28  ;;  %v195_v51 = vshll.u32 %v2614_v2, %v183_v19  ;;  %v196_v52 = vshrl.u32 %v2615_v4, %v184_v28 }
  0xdf   :  { %v188_v53 = vor.u32 %v187_v46, %v186_v45  ;;  %v191_v54 = vor.u32 %v190_v48, %v189_v47  ;;  %v198_v57 = vshll.u32 %v2615_v4, %v183_v19  ;;  %v199_v58 = vshrl.u32 %v2616_v11, %v184_v28 }
  0xe0   :  { %v328_v60 = vmul.u32 %v2767_v55, %v312_v35  ;;  %vm330_vm8 = vc.u32 %v2793_v41, %v2796_v43  ;;  %v331_v63 = vadd.s32 1, %v2797_v44  ;;  %v194_v1 = vor.u32 %v193_v50, %v192_v49 }
  0xe1   :  { %v185_v3 = vshrl.u32 %v2611_v59, %v184_v28  ;;  %v197_v5 = vor.u32 %v196_v52, %v195_v51  ;;  %v200_v6 = vor.u32 %v199_v58, %v198_v57  ;;  %vm201_vm9 = vcmp.lt.s32.totalorder %v182_v39, 1 }
  0xe2   :  { %v332_v7 = vsel %vm330_vm8, %v331_v63, %v2797_v44  ;;  %vm203_vm10 = vcmp.lt.s32.totalorder %v182_v39, 3  ;;  %vm204_vm11 = vcmp.lt.s32.totalorder %v182_v39, 4  ;;  %v209_v8 = vsel %vm201_vm9, %v188_v53, %v191_v54 }
  0xe3   :  { %v333_v9 = vadd.s32 %v332_v7, %v328_v60  ;;  %v206_v10 = vsel %vm204_vm11, %v194_v1, 2102212464  ;;  %v210_v12 = vsel %vm204_vm11, %v197_v5, 920167782  ;;  %v213_v55 = vsel %vm201_vm9, %v191_v54, %v194_v1 }
  0xe4   :  { %vm202_vm12 = vcmp.lt.s32.totalorder %v182_v39, 2  ;;  %v211_v13 = vsel %vm203_vm10, %v194_v1, %v210_v12  ;;  %v214_v14 = vsel %vm204_vm11, %v200_v6, 1326507024  ;;  %v2307_v15 = vadd.s32 4294967169, %v2772_v61 }
  0xe5   :  { %v205_v16 = vsel %vm201_vm9, %v185_v3, %v188_v53  ;;  %v207_v17 = vsel %vm203_vm10, %v191_v54, %v206_v10  ;;  %v212_v18 = vsel %vm202_vm12, %v209_v8, %v211_v13  ;;  %v215_v19 = vsel %vm203_vm10, %v197_v5, %v214_v14 }
  0xe6   :  { %v216_v20 = vsel %vm202_vm12, %v213_v55, %v215_v19  ;;  %v2818_v21 = vmul.u32.u64.low %v2769_v56, %v212_v18  ;;  %v2819_v22 = vmul.u32.u64.high %v2769_v56, %v212_v18, %v2818_v21  ;;  %vm492_vm13 = vcmp.gt.s32.totalorder %v491_v33, 0 }
  0xe7   :  { %v334_v23 = vadd.s32 536870912, %v333_v9  ;;  %v2823_v24 = vmul.u32.u64.low %v2769_v56, %v216_v20  ;;  %v2824_v25 = vmul.u32.u64.high %v2769_v56, %v216_v20, %v2823_v24  ;;  %v208_v27 = vsel %vm202_vm12, %v205_v16, %v207_v17 }
  0xe8   :  { %v387_v28 = vadd.s32 1, %v2307_v15  ;;  %v493_v30 = vsel %vm492_vm13, %v491_v33, 0  ;;  %v227_v61 = vadd.s32 1, %v2819_v22  ;;  %v224_v35 = vmul.u32 %v2769_v56, %v208_v27 }
  0xe9   :  { %v2827_v32 = vshrl.u32 %v334_v23, 30  ;;  %vm226_vm14 = vc.u32 %v2824_v25, %v2818_v21  ;;  %v377_v36 = vand.u32 2147483647, %v2763_v42  ;;  %v2834_v39 = vand.u32 31, %v493_v30 }
  0xea   :  { %v228_v37 = vsel %vm226_vm14, %v227_v61, %v2819_v22  ;;  %vm388_vm15 = vcmp.gt.s32.totalorder %v387_v28, 0  ;;  %v481_v52 = vand.u32 2147483647, %v2759_v38  ;;  %v2860_v13 = vshrl.u32 %v493_v30, 5 }
  0xeb   :  { %v229_v40 = vadd.s32 %v228_v37, %v224_v35  ;;  %v389_v44 = vsel %vm388_vm15, %v387_v28, 0  ;;  %v336_v33 = vshll.u32 %v2827_v32, 30  ;;  %v384_v47 = vand.u32 8388607, %v377_v36 }
  0xec   :  { %v391_v45 = vand.u32 31, %v389_v44  ;;  %v2840_v56 = vsub.s32 32, %v2834_v39  ;;  %v390_v6 = vshrl.u32 %v389_v44, 5  ;;  %v2864_v16 = vand.u32 8388607, %v481_v52 }
  0xed   :  { %v230_v46 = vadd.s32 536870912, %v229_v40  ;;  %v2847_v53 = vsub.s32 %v333_v9, %v336_v33  ;;  %v385_v54 = vor.u32 8388608, %v384_v47  ;;  %v507_v18 = vshll.u32 %v2614_v2, %v2834_v39 }
  0xee   :  { %v392_v48 = vsub.s32 32, %v391_v45  ;;  %v508_v60 = vshrl.u32 %v2615_v4, %v2840_v56  ;;  %v394_v63 = vshll.u32 %v2611_v59, %v391_v45  ;;  %v397_v1 = vshll.u32 %v2612_v62, %v391_v45 }
  0xef   :  { %v2842_v49 = vshrl.u32 %v230_v46, 30  ;;  %v403_v3 = vshll.u32 %v2614_v2, %v391_v45  ;;  %v400_v7 = vshll.u32 %v2613_v0, %v391_v45  ;;  %v406_v55 = vshll.u32 %v2615_v4, %v391_v45 }
  0xf0   :  { %v395_v50 = vshrl.u32 %v2612_v62, %v392_v48  ;;  %v398_v51 = vshrl.u32 %v2613_v0, %v392_v48  ;;  %v401_v57 = vshrl.u32 %v2614_v2, %v392_v48  ;;  %v404_v58 = vshrl.u32 %v2615_v4, %v392_v48 }
  0xf1   :  { %v232_v5 = vshll.u32 %v2842_v49, 30  ;;  %v407_v8 = vshrl.u32 %v2616_v11, %v392_v48  ;;  %v425_v15 = vshll.u32 %v385_v54, 8  ;;  %v339_v17 = vsub.s32 0, %v2847_v53 }
  0xf2   :  { %v396_v9 = vor.u32 %v395_v50, %v394_v63  ;;  %v399_v10 = vor.u32 %v398_v51, %v397_v1  ;;  %v405_v12 = vor.u32 %v404_v58, %v403_v3  ;;  %v402_v14 = vor.u32 %v401_v57, %v400_v7 }
  0xf3   :  { %v510_v19 = vshll.u32 %v2615_v4, %v2834_v39  ;;  %v408_v20 = vor.u32 %v407_v8, %v406_v55  ;;  %v2871_v22 = vsub.s32 %v229_v40, %v232_v5  ;;  %v511_v23 = vshrl.u32 %v2616_v11, %v2840_v56 }
  0xf4   :  { %vm409_vm0 = vcmp.lt.s32.totalorder %v390_v6, 1  ;;  %vm412_vm1 = vcmp.lt.s32.totalorder %v390_v6, 4  ;;  %v509_v24 = vor.u32 %v508_v60, %v507_v18  ;;  %v393_v61 = vshrl.u32 %v2611_v59, %v392_v48 }
  0xf5   :  { %v417_v27 = vsel %vm409_vm0, %v396_v9, %v399_v10  ;;  %v418_v28 = vsel %vm412_vm1, %v405_v12, 920167782  ;;  %v422_v30 = vsel %vm412_vm1, %v408_v20, 1326507024  ;;  %vm411_vm2 = vcmp.lt.s32.totalorder %v390_v6, 3 }
  0xf6   :  { %v414_v35 = vsel %vm412_vm1, %v402_v14, 2102212464  ;;  %v421_v37 = vsel %vm409_vm0, %v399_v10, %v402_v14  ;;  %v2304_v44 = vmin.u32 %v339_v17, %v2847_v53  ;;  %vm410_vm3 = vcmp.lt.s32.totalorder %v390_v6, 2 }
  0xf7   :  { %v419_v45 = vsel %vm411_vm2, %v402_v14, %v418_v28  ;;  %v423_v40 = vsel %vm411_vm2, %v405_v12, %v422_v30  ;;  %v235_v33 = vsub.s32 0, %v2871_v22  ;;  %v413_v46 = vsel %vm409_vm0, %v393_v61, %v396_v9 }
  0xf8   :  { %v420_v47 = vsel %vm410_vm3, %v417_v27, %v419_v45  ;;  %v499_v50 = vshrl.u32 %v2612_v62, %v2840_v56  ;;  %v415_v51 = vsel %vm411_vm2, %v399_v10, %v414_v35  ;;  %v424_v54 = vsel %vm410_vm3, %v421_v37, %v423_v40 }
  0xf9   :  { %v2882_v48 = vmul.u32.u64.low %v425_v15, %v420_v47  ;;  %v2883_v57 = vmul.u32.u64.high %v425_v15, %v420_v47, %v2882_v48  ;;  %v512_v58 = vor.u32 %v511_v23, %v510_v19  ;;  %v498_v1 = vshll.u32 %v2611_v59, %v2834_v39 }
  0xfa   :  { %v2886_v60 = vmul.u32.u64.low %v425_v15, %v424_v54  ;;  %v2887_v63 = vmul.u32.u64.high %v425_v15, %v424_v54, %v2886_v60  ;;  %v501_v3 = vshll.u32 %v2612_v62, %v2834_v39  ;;  %v502_v5 = vshrl.u32 %v2613_v0, %v2840_v56 }
  0xfb   :  { %v504_v7 = vshll.u32 %v2613_v0, %v2834_v39  ;;  %v505_v8 = vshrl.u32 %v2614_v2, %v2840_v56  ;;  %v341_v9 = vclz %v2304_v44  ;;  %v2300_v10 = vmin.u32 %v235_v33, %v2871_v22 }
  0xfc   :  { %vm516_vm4 = vcmp.lt.s32.totalorder %v2860_v13, 4  ;;  %v416_v12 = vsel %vm410_vm3, %v413_v46, %v415_v51  ;;  %v435_v55 = vadd.s32 1, %v2883_v57  ;;  %v500_v14 = vor.u32 %v499_v50, %v498_v1 }
  0xfd   :  { %v503_v17 = vor.u32 %v502_v5, %v501_v3  ;;  %v506_v18 = vor.u32 %v505_v8, %v504_v7  ;;  %v522_v19 = vsel %vm516_vm4, %v509_v24, 920167782  ;;  %v526_v39 = vsel %vm516_vm4, %v512_v58, 1326507024  ;;  %v585_v7 = vld [vmem:[%s3840_s3] sm:$0xff] }
  0xfe   :  { %v432_v20 = vmul.u32 %v425_v15, %v416_v12  ;;  %vm434_vm5 = vc.u32 %v2887_v63, %v2882_v48  ;;  %v489_v23 = vor.u32 8388608, %v2864_v16  ;;  %v237_v27 = vclz %v2300_v10 }
  0xff   :  { %v436_v6 = vsel %vm434_vm5, %v435_v55, %v2883_v57  ;;  %vm513_vm6 = vcmp.lt.s32.totalorder %v2860_v13, 1  ;;  %vm515_vm7 = vcmp.lt.s32.totalorder %v2860_v13, 3  ;;  %v2305_v28 = vadd.s32 4294967294, %v341_v9 }
 0x100   :  { %v437_v30 = vadd.s32 %v436_v6, %v432_v20  ;;  %v521_v61 = vsel %vm513_vm6, %v500_v14, %v503_v17  ;;  %v523_v15 = vsel %vm515_vm7, %v506_v18, %v522_v19  ;;  %v497_v35 = vshrl.u32 %v2611_v59, %v2840_v56 }
 0x101   :  { %vm514_vm8 = vcmp.lt.s32.totalorder %v2860_v13, 2  ;;  %v518_v37 = vsel %vm516_vm4, %v506_v18, 2102212464  ;;  %v525_v44 = vsel %vm513_vm6, %v503_v17, %v506_v18  ;;  %v527_v45 = vsel %vm515_vm7, %v509_v24, %v526_v39 }
 0x102   :  { %v438_v16 = vadd.s32 536870912, %v437_v30  ;;  %v2301_v40 = vadd.s32 4294967294, %v237_v27  ;;  %v524_v33 = vsel %vm514_vm8, %v521_v61, %v523_v15  ;;  %v528_v46 = vsel %vm514_vm8, %v525_v44, %v527_v45 }
 0x103   :  { %v529_v56 = vshll.u32 %v489_v23, 8  ;;  %vm2306_vm9 = vcmp.lt.s32.totalorder %v2305_v28, 0  ;;  %v517_v50 = vsel %vm513_vm6, %v497_v35, %v500_v14  ;;  %v519_v51 = vsel %vm515_vm7, %v503_v17, %v518_v37 }
 0x104   :  { %v2930_v47 = vshrl.u32 %v438_v16, 30  ;;  %v344_v1 = vsel %vm2306_vm9, 0, %v2305_v28  ;;  %vm2302_vm10 = vcmp.lt.s32.totalorder %v2301_v40, 0  ;;  %v520_v5 = vsel %vm514_vm8, %v517_v50, %v519_v51 }
 0x105   :  { %v2936_v54 = vmul.u32.u64.low %v529_v56, %v528_v46  ;;  %v2937_v57 = vmul.u32.u64.high %v529_v56, %v528_v46, %v2936_v54  ;;  %v2940_v58 = vmul.u32.u64.low %v529_v56, %v524_v33  ;;  %v2941_v60 = vmul.u32.u64.high %v529_v56, %v524_v33, %v2940_v58 }
 0x106   :  { %v440_v24 = vshll.u32 %v2930_v47, 30  ;;  %v349_v8 = vsub.s32 4294967266, %v344_v1  ;;  %v240_v9 = vsel %vm2302_vm10, 0, %v2301_v40  ;;  %v536_v55 = vmul.u32 %v529_v56, %v520_v5 }
 0x107   :  { %vm538_vm11 = vc.u32 %v2937_v57, %v2940_v58  ;;  %v539_v12 = vadd.s32 1, %v2941_v60  ;;  %vm613_vm12 = vcmask 261120   ;;  %v245_v13 = vsub.s32 4294967266, %v240_v9 }
 0x108   :  { %v441_v3 = vsub.s32 %v437_v30, %v440_v24  ;;  %2426 = vmatprep.mubr.msk.f32.mxu1 %vm613_vm12, %v585_v7  ;;  %v350_v19 = vadd.s32 127, %v349_v8  ;;  %v345_v23 = vsub.s32 32, %v344_v1  ;;  %v329_v30 = vadd.s32 %v2796_v43, %v2793_v41 }
 0x109   :  { %v540_v17 = vsel %vm538_vm11, %v539_v12, %v2941_v60  ;;  %v246_v6 = vadd.s32 127, %v245_v13  ;;  %v241_v15 = vsub.s32 32, %v240_v9  ;;  %v433_v44 = vadd.s32 %v2882_v48, %v2887_v63 }
 0x10a   :  { %v443_v10 = vsub.s32 0, %v441_v3  ;;  %v541_v18 = vadd.s32 %v540_v17, %v536_v55  ;;  %v351_v61 = vshll.u32 %v350_v19, 23  ;;  %v347_v37 = vshrl.u32 %v329_v30, %v345_v23 }
 0x10b   :  { %v346_v33 = vshll.u32 %v2847_v53, %v344_v1  ;;  %v225_v46 = vadd.s32 %v2818_v21, %v2824_v25  ;;  %v247_v56 = vshll.u32 %v246_v6, 23  ;;  %v242_v48 = vshll.u32 %v2871_v22, %v240_v9 }
 0x10c   :  { %v2308_v14 = vmin.u32 %v443_v10, %v441_v3  ;;  %v542_v20 = vadd.s32 536870912, %v541_v18  ;;  %v352_v41 = vor.u32 4788187, %v351_v61  ;;  %v537_v22 = vadd.s32 %v2940_v58, %v2937_v57 }
 0x10d   :  { %v243_v24 = vshrl.u32 %v225_v46, %v241_v15  ;;  %v348_v5 = vor.u32 %v347_v37, %v346_v33  ;;  %v248_v63 = vor.u32 4788187, %v247_v56  ;;  %vm379_vm15 = vcmp.lt.s32.totalorder %v2763_v42, 0 }
 0x10e   :  { %v445_v39 = vclz %v2308_v14  ;;  %v2954_v28 = vshrl.u32 %v542_v20, 30  ;;  %v353_v12 = vand.u32 2147483647, %v352_v41  ;;  %vm2972_vm0 = vcmp.le.f32.partialorder %v377_v36, 0.7853982 }
 0x10f   :  { %v244_v1 = vor.u32 %v243_v24, %v242_v48  ;;  %v355_v21 = vcvt.s32.f32 %v348_v5  ;;  %v249_v17 = vand.u32 2147483647, %v248_v63  ;;  %vm275_vm1 = vcmp.lt.s32.totalorder %v2749_v26, 0 }
 0x110   :  { %v2309_v27 = vadd.s32 4294967294, %v445_v39  ;;  %v544_v16 = vshll.u32 %v2954_v28, 30  ;;  %vm171_vm2 = vcmp.lt.s32.totalorder %v2753_v31, 0  ;;  %vm2985_vm3 = vcmp.le.f32.partialorder %v273_v29, 0.7853982 }
 0x111   :  { %v356_v13 = vmul.f32 %v355_v21, %v353_v12  ;;  %v251_v19 = vcvt.s32.f32 %v244_v1  ;;  %vm2997_vm4 = vcmp.le.f32.partialorder %v169_v34, 0.7853982  ;;  %v359_v24 = vsub.s32 4, %v2827_v32 }
 0x112   :  { %vm2310_vm13 = vcmp.lt.s32.totalorder %v2309_v27, 0  ;;  %v545_v50 = vsub.s32 %v541_v18, %v544_v16  ;;  %vm483_vm5 = vcmp.lt.s32.totalorder %v2759_v38, 0  ;;  %vm3009_vm6 = vcmp.le.f32.partialorder %v481_v52, 0.7853982 }
 0x113   :  { %v448_v35 = vsel %vm2310_vm13, 0, %v2309_v27  ;;  %v252_v23 = vmul.f32 %v251_v19, %v249_v17  ;;  %v357_v6 = vxor.u32 2147483648, %v356_v13  ;;  %v360_v48 = vsel %vm275_vm1, %v359_v24, %v2827_v32  ;;  %v606_v24 = vpop.permute.xlu1 %605 }
 0x114   :  { %v449_v45 = vsub.s32 32, %v448_v35  ;;  %v453_v40 = vsub.s32 4294967266, %v448_v35  ;;  %v450_v43 = vshll.u32 %v441_v3, %v448_v35  ;;  %v547_v60 = vsub.s32 0, %v545_v50 }
 0x115   :  { %v253_v16 = vxor.u32 2147483648, %v252_v23  ;;  %v358_v58 = vsel %vm275_vm1, %v357_v6, %v356_v13  ;;  %v255_v52 = vsub.s32 4, %v2842_v49  ;;  %vm573_vm7 = vweird.f32 %v2759_v38 }
 0x116   :  { %v451_v51 = vshrl.u32 %v433_v44, %v449_v45  ;;  %v454_v54 = vadd.s32 127, %v453_v40  ;;  %v2312_v10 = vmin.u32 %v547_v60, %v545_v50  ;;  %v567_v60 = vsub.s32 4, %v2954_v28 }
 0x117   :  { %v254_v36 = vsel %vm171_vm2, %v253_v16, %v252_v23  ;;  %v256_v1 = vsel %vm171_vm2, %v255_v52, %v2842_v49  ;;  %vm469_vm8 = vweird.f32 %v2763_v42 }
 0x118   :  { %v452_v7 = vor.u32 %v451_v51, %v450_v43  ;;  %v455_v8 = vshll.u32 %v454_v54, 23  ;;  %v549_v55 = vclz %v2312_v10  ;;  %v463_v43 = vsub.s32 4, %v2930_v47 }
 0x119   :  { %v257_v51 = vsel %vm2997_vm4, %v2753_v31, %v254_v36  ;;  %v568_v63 = vsel %vm483_vm5, %v567_v60, %v2954_v28  ;;  %v258_v28 = vsel %vm2997_vm4, 0, %v256_v1 }
 0x11a   :  { %v456_v53 = vor.u32 4788187, %v455_v8  ;;  %v459_v14 = vcvt.s32.f32 %v452_v7  ;;  %v2313_v3 = vadd.s32 4294967294, %v549_v55  ;;  %v464_v7 = vsel %vm379_vm15, %v463_v43, %v2930_v47 }
 0x11b   :  { %v466_v10 = vsel %vm2972_vm0, 0, %v464_v7  ;;  %v362_v47 = vsel %vm2985_vm3, 0, %v360_v48  ;;  %v570_v12 = vsel %vm3009_vm6, 0, %v568_v63  ;;  %v596_v7 = vpop.permute.xlu1 %595 }
 0x11c   :  { %v457_v25 = vand.u32 2147483647, %v456_v53  ;;  %vm2314_vm14 = vcmp.lt.s32.totalorder %v2313_v3, 0  ;;  %v470_v53 = vadd.s32 3, %v466_v10  ;;  %v366_v21 = vadd.s32 3, %v362_v47 }
 0x11d   :  { %v552_v20 = vsel %vm2314_vm14, 0, %v2313_v3 }
 0x11e   :  { %v460_v18 = vmul.f32 %v459_v14, %v457_v25  ;;  %v553_v9 = vsub.s32 32, %v552_v20  ;;  %v557_v27 = vsub.s32 4294967266, %v552_v20  ;;  %v554_v61 = vshll.u32 %v545_v50, %v552_v20 }
 0x11f   :  { %v361_v50 = vsel %vm2985_vm3, %v2749_v26, %v358_v58  ;;  %v574_v25 = vadd.s32 3, %v570_v12  ;;  %v471_v14 = vand.u32 3, %v470_v53  ;;  %v367_v19 = vand.u32 3, %v366_v21 }
 0x120   :  { %v461_v39 = vxor.u32 2147483648, %v460_v18  ;;  %v555_v15 = vshrl.u32 %v537_v22, %v553_v9  ;;  %v558_v35 = vadd.s32 127, %v557_v27 }
 0x121   :  { %v575_v23 = vand.u32 3, %v574_v25  ;;  %vm473_vm9 = vcmp.eq.s32.totalorder %v471_v14, 0  ;;  %vm476_vm10 = vcmp.eq.s32.totalorder %v471_v14, 2  ;;  %vm472_vm11 = vcmp.lt.s32.totalorder %v471_v14, 2 }
 0x122   :  { %v462_v30 = vsel %vm379_vm15, %v461_v39, %v460_v18  ;;  %v556_v37 = vor.u32 %v555_v15, %v554_v61  ;;  %v559_v44 = vshll.u32 %v558_v35, 23  ;;  %v262_v39 = vadd.s32 3, %v258_v28 }
 0x123   :  { %v465_v57 = vsel %vm2972_vm0, %v2763_v42, %v462_v30  ;;  %vm369_vm13 = vcmp.eq.s32.totalorder %v367_v19, 0  ;;  %vm580_vm14 = vcmp.eq.s32.totalorder %v575_v23, 2  ;;  %vm577_vm15 = vcmp.eq.s32.totalorder %v575_v23, 0  ;;  %v586_v42 = vld [vmem:[%s3840_s3 + $0x8] sm:$0xff] }
 0x124   :  { %v560_v40 = vor.u32 4788187, %v559_v44  ;;  %v563_v56 = vcvt.s32.f32 %v556_v37  ;;  %2546 = vcosq.f32 %v465_v57  ;;  %v263_v35 = vand.u32 3, %v262_v39 }
 0x125   :  { %2548 = vsinq.f32 %v465_v57  ;;  %vm372_vm0 = vcmp.eq.s32.totalorder %v367_v19, 2  ;;  %vm576_vm1 = vcmp.lt.s32.totalorder %v575_v23, 2  ;;  %vm368_vm2 = vcmp.lt.s32.totalorder %v367_v19, 2 }
 0x126   :  { %v561_v46 = vand.u32 2147483647, %v560_v40  ;;  %2550 = vcosq.f32 %v361_v50  ;;  %vm265_vm3 = vcmp.eq.s32.totalorder %v263_v35, 0  ;;  %vm268_vm4 = vcmp.eq.s32.totalorder %v263_v35, 2 }
 0x127   :  { %2552 = vsinq.f32 %v361_v50 }
 0x128   :  { %v564_v41 = vmul.f32 %v563_v56, %v561_v46  ;;  %2554 = vcosq.f32 %v257_v51 }
 0x129   :  { %2556 = vsinq.f32 %v257_v51 }
 0x12a   :  { %v565_v54 = vxor.u32 2147483648, %v564_v41 }
 0x12c   :  { %v566_v5 = vsel %vm483_vm5, %v565_v54, %v564_v41  ;;  %vm264_vm5 = vcmp.lt.s32.totalorder %v263_v35, 2  ;;  %v587_v54 = vld [vmem:[%s3840_s3 + $0x10] sm:$0xff] }
 0x12d   :  { %v569_v8 = vsel %vm3009_vm6, %v2759_v38, %v566_v5  ;;  %vm365_vm6 = vweird.f32 %v2749_v26  ;;  %v588_v26 = vld [vmem:[%s3840_s3 + $0x18] sm:$0xff] }
 0x12e   :  { %2558 = vcosq.f32 %v569_v8 }
 0x12f   :  { %2560 = vsinq.f32 %v569_v8 }
 0x131   :  { %v2547_v32 = vpop.eup %2546 }
 0x132   :  { %v2549_v55 = vpop.eup %2548  ;;  %v477_v13 = vxor.u32 2147483648, %v2547_v32 }
 0x133   :  { %v2551_v17 = vpop.eup %2550  ;;  %v474_v3 = vxor.u32 2147483648, %v2549_v55 }
 0x134   :  { %v2553_v18 = vpop.eup %2552  ;;  %v478_v27 = vsel %vm476_vm10, %v477_v13, %v2549_v55  ;;  %v373_v30 = vxor.u32 2147483648, %v2551_v17 }
 0x135   :  { %v2555_v20 = vpop.eup %2554  ;;  %v475_v9 = vsel %vm473_vm9, %v2547_v32, %v474_v3  ;;  %v370_v6 = vxor.u32 2147483648, %v2553_v18  ;;  %vm261_vm9 = vweird.f32 %v2753_v31  ;;  %v611_v31 = vpop.permute.xlu0 %610 }
 0x136   :  { %v2557_v22 = vpop.eup %2556  ;;  %v269_v44 = vxor.u32 2147483648, %v2555_v20  ;;  %v479_v57 = vsel %vm472_vm11, %v475_v9, %v478_v27  ;;  %v374_v33 = vsel %vm372_vm0, %v373_v30, %v2553_v18 }
 0x137   :  { %v266_v37 = vxor.u32 2147483648, %v2557_v22  ;;  %v371_v40 = vsel %vm369_vm13, %v2551_v17, %v370_v6  ;;  %v480_v56 = vsel %vm469_vm8, nan, %v479_v57 }
 0x138   :  { %v270_v41 = vsel %vm268_vm4, %v269_v44, %v2557_v22  ;;  %v375_v43 = vsel %vm368_vm2, %v371_v40, %v374_v33 }
 0x139   :  { %v267_v50 = vsel %vm265_vm3, %v2555_v20, %v266_v37  ;;  %v376_v51 = vsel %vm365_vm6, nan, %v375_v43  ;;  %v601_v60 = vpop.permute.xlu0 %600 }
 0x13a   :  { %v271_v29 = vsel %vm264_vm5, %v267_v50, %v270_v41 }
 0x13b   :  { %v2559_v49 = vpop.eup %2558  ;;  %v272_v38 = vsel %vm261_vm9, nan, %v271_v29 }
 0x13c   :  { %v2561_v61 = vpop.eup %2560  ;;  %v581_v15 = vxor.u32 2147483648, %v2559_v49 }
 0x13d   :  { %v578_v16 = vxor.u32 2147483648, %v2561_v61 }
 0x13e   :  { %v582_v45 = vsel %vm580_vm14, %v581_v15, %v2561_v61 }
 0x13f   :  { %v579_v58 = vsel %vm577_vm15, %v2559_v49, %v578_v16  ;;  %v1127_v16 = vld [vmem:[%s3841_s5] sm:$0xff] }
 0x140   :  { %v583_v36 = vsel %vm576_vm1, %v579_v58, %v582_v45  ;;  %2440 = vmatprep.mubr.msk.f32.mxu0 %vm613_vm12, %v1127_v16 }
 0x141   :  { %v584_v46 = vsel %vm573_vm7, nan, %v583_v36 }
 0x142   :  { %2418 = vmatprep.subr.mxu1 %v584_v46 }
 0x143   :  { %2419 = vmatpush3.msra.mxu1 %v584_v46 }
 0x144   :  { %2420 = vmatprep.subr.mxu1 %v480_v56 }
 0x145   :  { %2421 = vmatpush3.msra.mxu1 %v480_v56 }
 0x146   :  { %2422 = vmatprep.subr.mxu1 %v376_v51 }
 0x147   :  { %2423 = vmatpush3.msra.mxu1 %v376_v51 }
 0x148   :  { %2424 = vmatprep.subr.mxu1 %v272_v38 }
 0x149   :  { %2425 = vmatpush3.msra.mxu1 %v272_v38 }
 0x14a   :  { %2427 = vmatmul.mubr.msk.f32.vlgmr.msra.gmra.mxu1 %vm613_vm12, %v586_v42 }
 0x14b   :  { %2429 = vmatprep.mubr.msk.f32.mxu1 %vm613_vm12, %v587_v54 }
 0x14e   :  { %2430 = vmatmul.mubr.msk.f32.gmra.mxu1 %vm613_vm12, %v588_v26 }
 0x20a   :  { %v2428_v34 = vpop.f32.mrf.mxu1 }
 0x20b   :  { %v3055_v5 = vadd.f32 %v2428_v34, %v601_v60 }
 0x20c   :  { %v692_v8 = vpop.f32.mrf.mxu1 }
 0x20d   :  { %v815_v48 = vand.u32 2147483647, %v3055_v5  ;;  %v818_v52 = vand.u32 2139095040, %v3055_v5  ;;  %v3059_v63 = vadd.f32 %v692_v8, %v596_v7 }
 0x20e   :  { %v2431_v10 = vpop.f32.mrf.mxu1 }
 0x20f   :  { %v819_v47 = vshrl.u32 %v818_v52, 23  ;;  %v711_v12 = vand.u32 2147483647, %v3059_v63  ;;  %v822_v53 = vand.u32 8388607, %v815_v48  ;;  %v714_v1 = vand.u32 2139095040, %v3059_v63 }
 0x210   :  { %v3065_v32 = vadd.f32 %v2431_v10, %v611_v31  ;;  %v702_v19 = vpop.f32.mrf.mxu1 }
 0x211   :  { %v2323_v55 = vadd.s32 4294967169, %v819_v47  ;;  %v718_v21 = vand.u32 8388607, %v711_v12  ;;  %v715_v25 = vshrl.u32 %v714_v1, 23  ;;  %v823_v17 = vor.u32 8388608, %v822_v53 }
 0x212   :  { %v1026_v28 = vand.u32 2139095040, %v3065_v32  ;;  %v3070_v49 = vadd.f32 %v702_v19, %v606_v24  ;;  %v1023_v6 = vand.u32 2147483647, %v3065_v32 }
 0x213   :  { %v825_v14 = vadd.s32 1, %v2323_v55  ;;  %v2319_v3 = vadd.s32 4294967169, %v715_v25  ;;  %v719_v13 = vor.u32 8388608, %v718_v21  ;;  %v3072_v9 = vshll.u32 %v823_v17, 8 }
 0x214   :  { %v1027_v18 = vshrl.u32 %v1026_v28, 23 }
 0x215   :  { %vm826_vm7 = vcmp.gt.s32.totalorder %v825_v14, 0  ;;  %v721_v20 = vadd.s32 1, %v2319_v3  ;;  %v3074_v27 = vshll.u32 %v719_v13, 8 }
 0x216   :  { %v827_v39 = vsel %vm826_vm7, %v825_v14, 0  ;;  %v2331_v30 = vadd.s32 4294967169, %v1027_v18 }
 0x217   :  { %v828_v23 = vshrl.u32 %v827_v39, 5  ;;  %v829_v22 = vand.u32 31, %v827_v39  ;;  %vm722_vm8 = vcmp.gt.s32.totalorder %v721_v20, 0 }
 0x218   :  { %v723_v43 = vsel %vm722_vm8, %v721_v20, 0  ;;  %v1033_v47 = vadd.s32 1, %v2331_v30 }
 0x219   :  { %v830_v61 = vsub.s32 32, %v829_v22  ;;  %v832_v15 = vshll.u32 %v2611_v59, %v829_v22  ;;  %v835_v35 = vshll.u32 %v2612_v62, %v829_v22  ;;  %v838_v37 = vshll.u32 %v2613_v0, %v829_v22 }
 0x21a   :  { %v841_v44 = vshll.u32 %v2614_v2, %v829_v22  ;;  %v844_v45 = vshll.u32 %v2615_v4, %v829_v22  ;;  %vm847_vm10 = vcmp.lt.s32.totalorder %v828_v23, 1  ;;  %vm848_vm11 = vcmp.lt.s32.totalorder %v828_v23, 2 }
 0x21b   :  { %v833_v57 = vshrl.u32 %v2612_v62, %v830_v61  ;;  %v836_v58 = vshrl.u32 %v2613_v0, %v830_v61  ;;  %v839_v40 = vshrl.u32 %v2614_v2, %v830_v61  ;;  %v831_v33 = vshrl.u32 %v2611_v59, %v830_v61 }
 0x21c   :  { %v842_v36 = vshrl.u32 %v2615_v4, %v830_v61  ;;  %v845_v46 = vshrl.u32 %v2616_v11, %v830_v61  ;;  %vm849_vm13 = vcmp.lt.s32.totalorder %v828_v23, 3  ;;  %vm850_vm14 = vcmp.lt.s32.totalorder %v828_v23, 4 }
 0x21d   :  { %v834_v56 = vor.u32 %v833_v57, %v832_v15  ;;  %v837_v50 = vor.u32 %v836_v58, %v835_v35  ;;  %v840_v41 = vor.u32 %v839_v40, %v838_v37  ;;  %v725_v38 = vand.u32 31, %v723_v43 }
 0x21e   :  { %v843_v29 = vor.u32 %v842_v36, %v841_v44  ;;  %v846_v51 = vor.u32 %v845_v46, %v844_v45  ;;  %v724_v55 = vshrl.u32 %v723_v43, 5  ;;  %vm1034_vm4 = vcmp.gt.s32.totalorder %v1033_v47, 0 }
 0x21f   :  { %v851_v42 = vsel %vm847_vm10, %v831_v33, %v834_v56  ;;  %v852_v54 = vsel %vm850_vm14, %v840_v41, 2102212464  ;;  %v855_v26 = vsel %vm847_vm10, %v834_v56, %v837_v50  ;;  %v859_v31 = vsel %vm847_vm10, %v837_v50, %v840_v41 }
 0x220   :  { %v853_v24 = vsel %vm849_vm13, %v837_v50, %v852_v54  ;;  %v856_v60 = vsel %vm850_vm14, %v843_v29, 920167782  ;;  %v860_v34 = vsel %vm850_vm14, %v846_v51, 1326507024  ;;  %v726_v7 = vsub.s32 32, %v725_v38 }
 0x221   :  { %v854_v8 = vsel %vm848_vm11, %v851_v42, %v853_v24  ;;  %v857_v52 = vsel %vm849_vm13, %v840_v41, %v856_v60  ;;  %v861_v10 = vsel %vm849_vm13, %v843_v29, %v860_v34  ;;  %v728_v21 = vshll.u32 %v2611_v59, %v725_v38 }
 0x222   :  { %v858_v53 = vsel %vm848_vm11, %v855_v26, %v857_v52  ;;  %v862_v1 = vsel %vm848_vm11, %v859_v31, %v861_v10  ;;  %v870_v3 = vmul.u32 %v3072_v9, %v854_v8  ;;  %v729_v13 = vshrl.u32 %v2612_v62, %v726_v7 }
 0x223   :  { %v3104_v25 = vmul.u32.u64.low %v3072_v9, %v862_v1  ;;  %v3105_v28 = vmul.u32.u64.high %v3072_v9, %v862_v1, %v3104_v25  ;;  %v3108_v14 = vmul.u32.u64.low %v3072_v9, %v858_v53  ;;  %v3109_v17 = vmul.u32.u64.high %v3072_v9, %v858_v53, %v3108_v14 }
 0x224   :  { %v731_v18 = vshll.u32 %v2612_v62, %v725_v38  ;;  %v732_v19 = vshrl.u32 %v2613_v0, %v726_v7  ;;  %v734_v39 = vshll.u32 %v2613_v0, %v725_v38  ;;  %v735_v20 = vshrl.u32 %v2614_v2, %v726_v7 }
 0x225   :  { %v737_v23 = vshll.u32 %v2614_v2, %v725_v38  ;;  %v738_v22 = vshrl.u32 %v2615_v4, %v726_v7  ;;  %v730_v30 = vor.u32 %v729_v13, %v728_v21  ;;  %v740_v15 = vshll.u32 %v2615_v4, %v725_v38 }
 0x226   :  { %v733_v61 = vor.u32 %v732_v19, %v731_v18  ;;  %v741_v9 = vshrl.u32 %v2616_v11, %v726_v7  ;;  %vm872_vm15 = vc.u32 %v3105_v28, %v3108_v14  ;;  %v873_v35 = vadd.s32 1, %v3109_v17 }
 0x227   :  { %v727_v16 = vshrl.u32 %v2611_v59, %v726_v7  ;;  %v736_v37 = vor.u32 %v735_v20, %v734_v39  ;;  %v739_v44 = vor.u32 %v738_v22, %v737_v23  ;;  %vm743_vm0 = vcmp.lt.s32.totalorder %v724_v55, 1 }
 0x228   :  { %v742_v45 = vor.u32 %v741_v9, %v740_v15  ;;  %vm744_vm1 = vcmp.lt.s32.totalorder %v724_v55, 2  ;;  %v874_v57 = vsel %vm872_vm15, %v873_v35, %v3109_v17  ;;  %vm745_vm2 = vcmp.lt.s32.totalorder %v724_v55, 3 }
 0x229   :  { %vm746_vm3 = vcmp.lt.s32.totalorder %v724_v55, 4  ;;  %v751_v58 = vsel %vm743_vm0, %v730_v30, %v733_v61  ;;  %v875_v40 = vadd.s32 %v874_v57, %v870_v3  ;;  %v755_v46 = vsel %vm743_vm0, %v733_v61, %v736_v37 }
 0x22a   :  { %v748_v33 = vsel %vm746_vm3, %v736_v37, 2102212464  ;;  %v752_v36 = vsel %vm746_vm3, %v739_v44, 920167782  ;;  %v747_v56 = vsel %vm743_vm0, %v727_v16, %v730_v30  ;;  %v756_v41 = vsel %vm746_vm3, %v742_v45, 1326507024 }
 0x22b   :  { %v753_v50 = vsel %vm745_vm2, %v736_v37, %v752_v36  ;;  %v876_v43 = vadd.s32 536870912, %v875_v40  ;;  %v749_v29 = vsel %vm745_vm2, %v733_v61, %v748_v33  ;;  %v757_v38 = vsel %vm745_vm2, %v739_v44, %v756_v41 }
 0x22c   :  { %v754_v51 = vsel %vm744_vm1, %v751_v58, %v753_v50  ;;  %v758_v42 = vsel %vm744_vm1, %v755_v46, %v757_v38  ;;  %v1030_v31 = vand.u32 8388607, %v1023_v6  ;;  %v1035_v7 = vsel %vm1034_vm4, %v1033_v47, 0 }
 0x22d   :  { %v3130_v54 = vmul.u32.u64.low %v3074_v27, %v754_v51  ;;  %v3131_v26 = vmul.u32.u64.high %v3074_v27, %v754_v51, %v3130_v54  ;;  %v3136_v24 = vshrl.u32 %v876_v43, 30  ;;  %v750_v8 = vsel %vm744_vm1, %v747_v56, %v749_v29 }
 0x22e   :  { %v3139_v60 = vmul.u32.u64.low %v3074_v27, %v758_v42  ;;  %v3140_v34 = vmul.u32.u64.high %v3074_v27, %v758_v42, %v3139_v60  ;;  %v1037_v52 = vand.u32 31, %v1035_v7  ;;  %v1031_v53 = vor.u32 8388608, %v1030_v31 }
 0x22f   :  { %v769_v10 = vadd.s32 1, %v3131_v26  ;;  %v922_v21 = vand.u32 2139095040, %v3070_v49  ;;  %v878_v25 = vshll.u32 %v3136_v24, 30  ;;  %v766_v17 = vmul.u32 %v3074_v27, %v750_v8 }
 0x230   :  { %v1038_v1 = vsub.s32 32, %v1037_v52  ;;  %vm768_vm5 = vc.u32 %v3140_v34, %v3130_v54  ;;  %v1040_v3 = vshll.u32 %v2611_v59, %v1037_v52  ;;  %v1043_v13 = vshll.u32 %v2612_v62, %v1037_v52 }
 0x231   :  { %v770_v47 = vsel %vm768_vm5, %v769_v10, %v3131_v26  ;;  %v1036_v39 = vshrl.u32 %v1035_v7, 5  ;;  %v1046_v20 = vshll.u32 %v2613_v0, %v1037_v52  ;;  %v1049_v30 = vshll.u32 %v2614_v2, %v1037_v52 }
 0x232   :  { %v1041_v55 = vshrl.u32 %v2612_v62, %v1038_v1  ;;  %v1044_v18 = vshrl.u32 %v2613_v0, %v1038_v1  ;;  %v771_v19 = vadd.s32 %v770_v47, %v766_v17  ;;  %v1047_v23 = vshrl.u32 %v2614_v2, %v1038_v1 }
 0x233   :  { %v1050_v61 = vshrl.u32 %v2615_v4, %v1038_v1  ;;  %v1052_v35 = vshll.u32 %v2615_v4, %v1037_v52  ;;  %v1053_v16 = vshrl.u32 %v2616_v11, %v1038_v1  ;;  %v3160_v37 = vsub.s32 %v875_v40, %v878_v25 }
 0x234   :  { %v1042_v27 = vor.u32 %v1041_v55, %v1040_v3  ;;  %v1045_v22 = vor.u32 %v1044_v18, %v1043_v13  ;;  %v772_v15 = vadd.s32 536870912, %v771_v19  ;;  %v1048_v9 = vor.u32 %v1047_v23, %v1046_v20 }
 0x235   :  { %v1051_v44 = vor.u32 %v1050_v61, %v1049_v30  ;;  %v1071_v45 = vshll.u32 %v1031_v53, 8  ;;  %v923_v57 = vshrl.u32 %v922_v21, 23  ;;  %v1054_v33 = vor.u32 %v1053_v16, %v1052_v35 }
 0x236   :  { %v3162_v58 = vshrl.u32 %v772_v15, 30  ;;  %vm1055_vm6 = vcmp.lt.s32.totalorder %v1036_v39, 1  ;;  %vm1058_vm9 = vcmp.lt.s32.totalorder %v1036_v39, 4  ;;  %vm1057_vm7 = vcmp.lt.s32.totalorder %v1036_v39, 3 }
 0x237   :  { %v1060_v36 = vsel %vm1058_vm9, %v1048_v9, 2102212464  ;;  %v1063_v46 = vsel %vm1055_vm6, %v1042_v27, %v1045_v22  ;;  %v1064_v56 = vsel %vm1058_vm9, %v1051_v44, 920167782  ;;  %v1039_v41 = vshrl.u32 %v2611_v59, %v1038_v1 }
 0x238   :  { %v774_v50 = vshll.u32 %v3162_v58, 30  ;;  %vm1056_vm8 = vcmp.lt.s32.totalorder %v1036_v39, 2  ;;  %v1065_v43 = vsel %vm1057_vm7, %v1048_v9, %v1064_v56  ;;  %v1067_v29 = vsel %vm1055_vm6, %v1045_v22, %v1048_v9 }
 0x239   :  { %v1066_v40 = vsel %vm1056_vm8, %v1063_v46, %v1065_v43  ;;  %v1068_v51 = vsel %vm1058_vm9, %v1054_v33, 1326507024  ;;  %v2327_v38 = vadd.s32 4294967169, %v923_v57  ;;  %v881_v42 = vsub.s32 0, %v3160_v37 }
 0x23a   :  { %v1059_v26 = vsel %vm1055_vm6, %v1039_v41, %v1042_v27  ;;  %v1061_v31 = vsel %vm1057_vm7, %v1045_v22, %v1060_v36  ;;  %v1069_v60 = vsel %vm1057_vm7, %v1051_v44, %v1068_v51  ;;  %v3168_v7 = vsub.s32 %v771_v19, %v774_v50 }
 0x23b   :  { %v1070_v8 = vsel %vm1056_vm8, %v1067_v29, %v1069_v60  ;;  %v3171_v52 = vmul.u32.u64.low %v1071_v45, %v1066_v40  ;;  %v3172_v10 = vmul.u32.u64.high %v1071_v45, %v1066_v40, %v3171_v52  ;;  %v929_v21 = vadd.s32 1, %v2327_v38 }
 0x23c   :  { %v3175_v53 = vmul.u32.u64.low %v1071_v45, %v1070_v8  ;;  %v3176_v1 = vmul.u32.u64.high %v1071_v45, %v1070_v8, %v3175_v53  ;;  %v2324_v25 = vmin.u32 %v881_v42, %v3160_v37  ;;  %v1062_v17 = vsel %vm1056_vm8, %v1059_v26, %v1061_v31 }
 0x23d   :  { %v919_v3 = vand.u32 2147483647, %v3070_v49  ;;  %v777_v47 = vsub.s32 0, %v3168_v7  ;;  %v1081_v55 = vadd.s32 1, %v3172_v10  ;;  %vm930_vm10 = vcmp.gt.s32.totalorder %v929_v21, 0 }
 0x23e   :  { %v931_v13 = vsel %vm930_vm10, %v929_v21, 0  ;;  %v1078_v18 = vmul.u32 %v1071_v45, %v1062_v17  ;;  %vm1080_vm11 = vc.u32 %v3176_v1, %v3171_v52  ;;  %v883_v20 = vclz %v2324_v25 }
 0x23f   :  { %v933_v19 = vand.u32 31, %v931_v13  ;;  %v1082_v23 = vsel %vm1080_vm11, %v1081_v55, %v3172_v10  ;;  %v926_v39 = vand.u32 8388607, %v919_v3  ;;  %v2320_v27 = vmin.u32 %v777_v47, %v3168_v7 }
 0x240   :  { %v1083_v22 = vadd.s32 %v1082_v23, %v1078_v18  ;;  %v2325_v15 = vadd.s32 4294967294, %v883_v20  ;;  %v932_v41 = vshrl.u32 %v931_v13, 5  ;;  %vm1025_vm5 = vcmp.lt.s32.totalorder %v3065_v32, 0 }
 0x241   :  { %v934_v30 = vsub.s32 32, %v933_v19  ;;  %v927_v9 = vor.u32 8388608, %v926_v39  ;;  %v779_v16 = vclz %v2320_v27  ;;  %v936_v33 = vshll.u32 %v2611_v59, %v933_v19 }
 0x242   :  { %v1084_v61 = vadd.s32 536870912, %v1083_v22  ;;  %v939_v36 = vshll.u32 %v2612_v62, %v933_v19  ;;  %v945_v46 = vshll.u32 %v2614_v2, %v933_v19  ;;  %v942_v43 = vshll.u32 %v2613_v0, %v933_v19 }
 0x243   :  { %v937_v35 = vshrl.u32 %v2612_v62, %v934_v30  ;;  %v940_v45 = vshrl.u32 %v2613_v0, %v934_v30  ;;  %v943_v57 = vshrl.u32 %v2614_v2, %v934_v30  ;;  %v946_v56 = vshrl.u32 %v2615_v4, %v934_v30 }
 0x244   :  { %v3190_v44 = vshrl.u32 %v1084_v61, 30  ;;  %v948_v26 = vshll.u32 %v2615_v4, %v933_v19  ;;  %v949_v31 = vshrl.u32 %v2616_v11, %v934_v30  ;;  %vm2326_vm13 = vcmp.lt.s32.totalorder %v2325_v15, 0 }
 0x245   :  { %v938_v40 = vor.u32 %v937_v35, %v936_v33  ;;  %v941_v29 = vor.u32 %v940_v45, %v939_v36  ;;  %v947_v51 = vor.u32 %v946_v56, %v945_v46  ;;  %v944_v42 = vor.u32 %v943_v57, %v942_v43 }
 0x246   :  { %v1086_v50 = vshll.u32 %v3190_v44, 30  ;;  %v2321_v60 = vadd.s32 4294967294, %v779_v16  ;;  %v967_v8 = vshll.u32 %v927_v9, 8  ;;  %v950_v53 = vor.u32 %v949_v31, %v948_v26 }
 0x247   :  { %vm951_vm14 = vcmp.lt.s32.totalorder %v932_v41, 1  ;;  %vm954_vm15 = vcmp.lt.s32.totalorder %v932_v41, 4  ;;  %vm952_vm0 = vcmp.lt.s32.totalorder %v932_v41, 2  ;;  %vm953_vm1 = vcmp.lt.s32.totalorder %v932_v41, 3 }
 0x248   :  { %v1087_v38 = vsub.s32 %v1083_v22, %v1086_v50  ;;  %v959_v21 = vsel %vm951_vm14, %v938_v40, %v941_v29  ;;  %v960_v25 = vsel %vm954_vm15, %v947_v51, 920167782  ;;  %v956_v47 = vsel %vm954_vm15, %v944_v42, 2102212464 }
 0x249   :  { %v961_v55 = vsel %vm953_vm1, %v944_v42, %v960_v25  ;;  %v963_v13 = vsel %vm951_vm14, %v941_v29, %v944_v42  ;;  %v886_v18 = vsel %vm2326_vm13, 0, %v2325_v15  ;;  %v935_v19 = vshrl.u32 %v2611_v59, %v934_v30 }
 0x24a   :  { %v1089_v10 = vsub.s32 0, %v1087_v38  ;;  %v962_v20 = vsel %vm952_vm0, %v959_v21, %v961_v55  ;;  %v964_v23 = vsel %vm954_vm15, %v950_v53, 1326507024  ;;  %vm2322_vm2 = vcmp.lt.s32.totalorder %v2321_v60, 0 }
 0x24b   :  { %v965_v27 = vsel %vm953_vm1, %v947_v51, %v964_v23  ;;  %v3208_v22 = vmul.u32.u64.low %v967_v8, %v962_v20  ;;  %v3209_v61 = vmul.u32.u64.high %v967_v8, %v962_v20, %v3208_v22  ;;  %v955_v9 = vsel %vm951_vm14, %v935_v19, %v938_v40 }
 0x24c   :  { %v2332_v17 = vmin.u32 %v1089_v10, %v1087_v38  ;;  %v957_v35 = vsel %vm953_vm1, %v941_v29, %v956_v47  ;;  %v966_v16 = vsel %vm952_vm0, %v963_v13, %v965_v27  ;;  %v891_v57 = vsub.s32 4294967266, %v886_v18 }
 0x24d   :  { %v3215_v45 = vmul.u32.u64.low %v967_v8, %v966_v16  ;;  %v3216_v30 = vmul.u32.u64.high %v967_v8, %v966_v16, %v3215_v45  ;;  %v782_v33 = vsel %vm2322_vm2, 0, %v2321_v60  ;;  %v958_v36 = vsel %vm952_vm0, %v955_v9, %v957_v35 }
 0x24e   :  { %v1091_v39 = vclz %v2332_v17  ;;  %v977_v46 = vadd.s32 1, %v3209_v61  ;;  %v1079_v50 = vadd.s32 %v3171_v52, %v3176_v1  ;;  %v892_v29 = vadd.s32 127, %v891_v57 }
 0x24f   :  { %v787_v51 = vsub.s32 4294967266, %v782_v33  ;;  %v974_v42 = vmul.u32 %v967_v8, %v958_v36  ;;  %vm976_vm4 = vc.u32 %v3216_v30, %v3208_v22  ;;  %v887_v53 = vsub.s32 32, %v886_v18 }
 0x250   :  { %v2333_v15 = vadd.s32 4294967294, %v1091_v39  ;;  %v978_v41 = vsel %vm976_vm4, %v977_v46, %v3209_v61  ;;  %v871_v52 = vadd.s32 %v3108_v14, %v3105_v28  ;;  %v893_v1 = vshll.u32 %v892_v29, 23 }
 0x251   :  { %v979_v10 = vadd.s32 %v978_v41, %v974_v42  ;;  %v788_v17 = vadd.s32 127, %v787_v51  ;;  %v783_v8 = vsub.s32 32, %v782_v33  ;;  %v767_v23 = vadd.s32 %v3130_v54, %v3140_v34 }
 0x252   :  { %vm2334_vm3 = vcmp.lt.s32.totalorder %v2333_v15, 0  ;;  %v889_v19 = vshrl.u32 %v871_v52, %v887_v53  ;;  %v888_v61 = vshll.u32 %v3160_v37, %v886_v18  ;;  %v894_v9 = vor.u32 4788187, %v893_v1 }
 0x253   :  { %v1094_v56 = vsel %vm2334_vm3, 0, %v2333_v15  ;;  %v980_v47 = vadd.s32 536870912, %v979_v10  ;;  %v789_v39 = vshll.u32 %v788_v17, 23  ;;  %v785_v16 = vshrl.u32 %v767_v23, %v783_v8 }
 0x254   :  { %v1095_v43 = vsub.s32 32, %v1094_v56  ;;  %v1099_v40 = vsub.s32 4294967266, %v1094_v56  ;;  %v1096_v26 = vshll.u32 %v1087_v38, %v1094_v56  ;;  %v890_v14 = vor.u32 %v889_v19, %v888_v61 }
 0x255   :  { %v3227_v13 = vshrl.u32 %v980_v47, 30  ;;  %v784_v45 = vshll.u32 %v3168_v7, %v782_v33  ;;  %v790_v57 = vor.u32 4788187, %v789_v39  ;;  %v1109_v46 = vsub.s32 4, %v3190_v44 }
 0x256   :  { %v1097_v31 = vshrl.u32 %v1079_v50, %v1095_v43  ;;  %v1100_v60 = vadd.s32 127, %v1099_v40  ;;  %v895_v54 = vand.u32 2147483647, %v894_v9  ;;  %vm3240_vm6 = vcmp.le.f32.partialorder %v1023_v6, 0.7853982 }
 0x257   :  { %v982_v27 = vshll.u32 %v3227_v13, 30  ;;  %v786_v18 = vor.u32 %v785_v16, %v784_v45  ;;  %v897_v33 = vcvt.s32.f32 %v890_v14  ;;  %v791_v50 = vand.u32 2147483647, %v790_v57 }
 0x258   :  { %v1098_v21 = vor.u32 %v1097_v31, %v1096_v26  ;;  %v1101_v25 = vshll.u32 %v1100_v60, 23  ;;  %v1110_v40 = vsel %vm1025_vm5, %v1109_v46, %v3190_v44  ;;  %v975_v41 = vadd.s32 %v3208_v22, %v3216_v30 }
 0x259   :  { %v983_v28 = vsub.s32 %v979_v10, %v982_v27  ;;  %v898_v29 = vmul.f32 %v897_v33, %v895_v54  ;;  %v793_v6 = vcvt.s32.f32 %v786_v18  ;;  %v1112_v42 = vsel %vm3240_vm6, 0, %v1110_v40 }
 0x25a   :  { %v1102_v55 = vor.u32 4788187, %v1101_v25  ;;  %v1105_v20 = vcvt.s32.f32 %v1098_v21  ;;  %v1116_v21 = vadd.s32 3, %v1112_v42  ;;  %vm817_vm7 = vcmp.lt.s32.totalorder %v3055_v5, 0 }
 0x25b   :  { %v985_v36 = vsub.s32 0, %v983_v28  ;;  %v794_v26 = vmul.f32 %v793_v6, %v791_v50  ;;  %v899_v31 = vxor.u32 2147483648, %v898_v29  ;;  %vm713_vm8 = vcmp.lt.s32.totalorder %v3059_v63, 0 }
 0x25c   :  { %v1103_v38 = vand.u32 2147483647, %v1102_v55  ;;  %v1117_v8 = vand.u32 3, %v1116_v21  ;;  %vm3262_vm10 = vcmp.le.f32.partialorder %v815_v48, 0.7853982  ;;  %vm1115_vm0 = vweird.f32 %v3065_v32 }
 0x25d   :  { %v2328_v56 = vmin.u32 %v985_v36, %v983_v28  ;;  %v795_v25 = vxor.u32 2147483648, %v794_v26  ;;  %v900_v52 = vsel %vm817_vm7, %v899_v31, %v898_v29  ;;  %vm3271_vm11 = vcmp.le.f32.partialorder %v711_v12, 0.7853982 }
 0x25e   :  { %v1106_v35 = vmul.f32 %v1105_v20, %v1103_v38  ;;  %v903_v39 = vsel %vm3262_vm10, %v3055_v5, %v900_v52  ;;  %vm1122_vm13 = vcmp.eq.s32.totalorder %v1117_v8, 2  ;;  %vm1119_vm14 = vcmp.eq.s32.totalorder %v1117_v8, 0 }
 0x25f   :  { %v987_v43 = vclz %v2328_v56  ;;  %v796_v22 = vsel %vm713_vm8, %v795_v25, %v794_v26  ;;  %vm1118_vm15 = vcmp.lt.s32.totalorder %v1117_v8, 2  ;;  %v901_v57 = vsub.s32 4, %v3136_v24 }
 0x260   :  { %v1107_v15 = vxor.u32 2147483648, %v1106_v35  ;;  %v799_v16 = vsel %vm3271_vm11, %v3059_v63, %v796_v22  ;;  %vm921_vm1 = vcmp.lt.s32.totalorder %v3070_v49, 0  ;;  %v1005_v36 = vsub.s32 4, %v3227_v13 }
 0x261   :  { %v2329_v51 = vadd.s32 4294967294, %v987_v43  ;;  %vm920_vm2 = vcmp.le.f32.partialorder %v919_v3, 0.7853982 }
 0x262   :  { %v1108_v34 = vsel %vm1025_vm5, %v1107_v15, %v1106_v35  ;;  %v1006_v37 = vsel %vm921_vm1, %v1005_v36, %v3227_v13 }
 0x263   :  { %v1111_v7 = vsel %vm3240_vm6, %v3065_v32, %v1108_v34  ;;  %vm2330_vm9 = vcmp.lt.s32.totalorder %v2329_v51, 0  ;;  %v797_v32 = vsub.s32 4, %v3162_v58  ;;  %v902_v34 = vsel %vm817_vm7, %v901_v57, %v3136_v24 }
 0x264   :  { %2562 = vcosq.f32 %v1111_v7  ;;  %v990_v60 = vsel %vm2330_vm9, 0, %v2329_v51  ;;  %v904_v56 = vsel %vm3262_vm10, 0, %v902_v34  ;;  %v1008_v3 = vsel %vm920_vm2, 0, %v1006_v37 }
 0x265   :  { %2564 = vsinq.f32 %v1111_v7  ;;  %v991_v10 = vsub.s32 32, %v990_v60  ;;  %v995_v53 = vsub.s32 4294967266, %v990_v60  ;;  %v992_v17 = vshll.u32 %v983_v28, %v990_v60 }
 0x266   :  { %2566 = vcosq.f32 %v903_v39  ;;  %v798_v18 = vsel %vm713_vm8, %v797_v32, %v3162_v58  ;;  %v908_v33 = vadd.s32 3, %v904_v56  ;;  %v1012_v43 = vadd.s32 3, %v1008_v3 }
 0x267   :  { %v993_v44 = vshrl.u32 %v975_v41, %v991_v10  ;;  %v996_v47 = vadd.s32 127, %v995_v53  ;;  %2568 = vsinq.f32 %v903_v39  ;;  %v800_v7 = vsel %vm3271_vm11, 0, %v798_v18 }
 0x268   :  { %2570 = vcosq.f32 %v799_v16  ;;  %v804_v29 = vadd.s32 3, %v800_v7  ;;  %v909_v13 = vand.u32 3, %v908_v33  ;;  %v1013_v51 = vand.u32 3, %v1012_v43 }
 0x269   :  { %v994_v1 = vor.u32 %v993_v44, %v992_v17  ;;  %v997_v55 = vshll.u32 %v996_v47, 23  ;;  %2572 = vsinq.f32 %v799_v16  ;;  %vm1011_vm11 = vweird.f32 %v3070_v49 }
 0x26a   :  { %v805_v31 = vand.u32 3, %v804_v29  ;;  %vm910_vm3 = vcmp.lt.s32.totalorder %v909_v13, 2  ;;  %vm911_vm4 = vcmp.eq.s32.totalorder %v909_v13, 0  ;;  %vm914_vm5 = vcmp.eq.s32.totalorder %v909_v13, 2 }
 0x26b   :  { %v998_v30 = vor.u32 4788187, %v997_v55  ;;  %v1001_v9 = vcvt.s32.f32 %v994_v1  ;;  %vm1018_vm6 = vcmp.eq.s32.totalorder %v1013_v51, 2  ;;  %vm1015_vm9 = vcmp.eq.s32.totalorder %v1013_v51, 0 }
 0x26c   :  { %vm807_vm7 = vcmp.eq.s32.totalorder %v805_v31, 0  ;;  %vm810_vm8 = vcmp.eq.s32.totalorder %v805_v31, 2  ;;  %vm1014_vm10 = vcmp.lt.s32.totalorder %v1013_v51, 2 }
 0x26d   :  { %v999_v61 = vand.u32 2147483647, %v998_v30 }
 0x26f   :  { %v1002_v28 = vmul.f32 %v1001_v9, %v999_v61 }
 0x271   :  { %v2563_v19 = vpop.eup %2562  ;;  %v1003_v15 = vxor.u32 2147483648, %v1002_v28 }
 0x272   :  { %v2565_v20 = vpop.eup %2564  ;;  %v1123_v23 = vxor.u32 2147483648, %v2563_v19 }
 0x273   :  { %v1120_v35 = vxor.u32 2147483648, %v2565_v20  ;;  %v1004_v46 = vsel %vm921_vm1, %v1003_v15, %v1002_v28  ;;  %v2567_v50 = vpop.eup %2566 }
 0x274   :  { %v1124_v48 = vsel %vm1122_vm13, %v1123_v23, %v2565_v20  ;;  %v1007_v54 = vsel %vm920_vm2, %v3070_v49, %v1004_v46  ;;  %v2569_v40 = vpop.eup %2568  ;;  %v915_v26 = vxor.u32 2147483648, %v2567_v50  ;;  %vm806_vm13 = vcmp.lt.s32.totalorder %v805_v31, 2  ;;  %v1128_v49 = vld [vmem:[%s3841_s5 + $0x8] sm:$0xff]  ;;  %v1129_v20 = vld [vmem:[%s3841_s5 + $0x10] sm:$0xff]  ;;  %v1148_v23 = vpop.permute.xlu1 %1147 }
 0x275   :  { %v1121_v14 = vsel %vm1119_vm14, %v2563_v19, %v1120_v35  ;;  %2574 = vcosq.f32 %v1007_v54  ;;  %v2571_v24 = vpop.eup %2570  ;;  %v912_v42 = vxor.u32 2147483648, %v2569_v40  ;;  %vm907_vm14 = vweird.f32 %v3055_v5  ;;  %v1130_v5 = vld [vmem:[%s3841_s5 + $0x18] sm:$0xff] }
 0x276   :  { %v1125_v12 = vsel %vm1118_vm15, %v1121_v14, %v1124_v48  ;;  %2576 = vsinq.f32 %v1007_v54  ;;  %v2573_v6 = vpop.eup %2572  ;;  %v811_v41 = vxor.u32 2147483648, %v2571_v24  ;;  %v916_v17 = vsel %vm914_vm5, %v915_v26, %v2569_v40 }
 0x277   :  { %v1126_v45 = vsel %vm1115_vm0, nan, %v1125_v12  ;;  %v808_v60 = vxor.u32 2147483648, %v2573_v6  ;;  %v913_v25 = vsel %vm911_vm4, %v2567_v50, %v912_v42  ;;  %vm803_vm15 = vweird.f32 %v3059_v63  ;;  %v1153_v63 = vpop.permute.xlu0 %1152 }
 0x278   :  { %2432 = vmatprep.subr.mxu0 %v1126_v45  ;;  %v812_v1 = vsel %vm810_vm8, %v811_v41, %v2573_v6  ;;  %v917_v8 = vsel %vm910_vm3, %v913_v25, %v916_v17  ;;  %v1138_v9 = vpop.permute.xlu1 %1137 }
 0x279   :  { %2433 = vmatpush3.msra.mxu0 %v1126_v45  ;;  %v809_v52 = vsel %vm807_vm7, %v2571_v24, %v808_v60  ;;  %v918_v30 = vsel %vm907_vm14, nan, %v917_v8  ;;  %v1668_v60 = vld [vmem:[%s3842_s7] sm:$0xff] }
 0x27a   :  { %v813_v22 = vsel %vm806_vm13, %v809_v52, %v812_v1  ;;  %2454 = vmatprep.mubr.msk.f32.mxu1 %vm613_vm12, %v1668_v60 }
 0x27b   :  { %v814_v38 = vsel %vm803_vm15, nan, %v813_v22  ;;  %v1143_v39 = vpop.permute.xlu0 %1142 }
 0x282   :  { %v2575_v58 = vpop.eup %2574 }
 0x283   :  { %v2577_v10 = vpop.eup %2576  ;;  %v1019_v53 = vxor.u32 2147483648, %v2575_v58 }
 0x284   :  { %v1016_v21 = vxor.u32 2147483648, %v2577_v10 }
 0x285   :  { %v1020_v44 = vsel %vm1018_vm6, %v1019_v53, %v2577_v10 }
 0x286   :  { %v1017_v47 = vsel %vm1015_vm9, %v2575_v58, %v1016_v21 }
 0x287   :  { %v1021_v55 = vsel %vm1014_vm10, %v1017_v47, %v1020_v44 }
 0x288   :  { %v1022_v19 = vsel %vm1011_vm11, nan, %v1021_v55 }
 0x289   :  { %2434 = vmatprep.subr.mxu0 %v1022_v19 }
 0x28a   :  { %2435 = vmatpush3.msra.mxu0 %v1022_v19 }
 0x28b   :  { %2436 = vmatprep.subr.mxu0 %v918_v30 }
 0x28c   :  { %2437 = vmatpush3.msra.mxu0 %v918_v30 }
 0x28d   :  { %2438 = vmatprep.subr.mxu0 %v814_v38 }
 0x28e   :  { %2439 = vmatpush3.msra.mxu0 %v814_v38 }
 0x28f   :  { %2441 = vmatmul.mubr.msk.f32.vlgmr.msra.gmra.mxu0 %vm613_vm12, %v1128_v49 }
 0x290   :  { %2443 = vmatprep.mubr.msk.f32.mxu0 %vm613_vm12, %v1129_v20 }
 0x293   :  { %2444 = vmatmul.mubr.msk.f32.gmra.mxu0 %vm613_vm12, %v1130_v5 }
 0x34f   :  { %v2442_v27 = vpop.f32.mrf.mxu0 }
 0x350   :  { %v3313_v61 = vadd.f32 %v2442_v27, %v1143_v39 }
 0x351   :  { %v1233_v35 = vpop.f32.mrf.mxu0 }
 0x352   :  { %v1356_v48 = vand.u32 2147483647, %v3313_v61  ;;  %v1359_v16 = vand.u32 2139095040, %v3313_v61  ;;  %v3317_v28 = vadd.f32 %v1233_v35, %v1138_v9 }
 0x353   :  { %v2445_v14 = vpop.f32.mrf.mxu0 }
 0x354   :  { %v1360_v12 = vshrl.u32 %v1359_v16, 23  ;;  %v1252_v15 = vand.u32 2147483647, %v3317_v28  ;;  %v1363_v45 = vand.u32 8388607, %v1356_v48  ;;  %v1255_v57 = vand.u32 2139095040, %v3317_v28 }
 0x355   :  { %v3323_v36 = vadd.f32 %v2445_v14, %v1153_v63  ;;  %v1243_v33 = vpop.f32.mrf.mxu0 }
 0x356   :  { %v2343_v46 = vadd.s32 4294967169, %v1360_v12  ;;  %v1259_v32 = vand.u32 8388607, %v1252_v15  ;;  %v1256_v54 = vshrl.u32 %v1255_v57, 23  ;;  %v1364_v18 = vor.u32 8388608, %v1363_v45 }
 0x357   :  { %v1567_v34 = vand.u32 2139095040, %v3323_v36  ;;  %v3328_v24 = vadd.f32 %v1243_v33, %v1148_v23  ;;  %v1564_v51 = vand.u32 2147483647, %v3323_v36 }
 0x358   :  { %v1366_v37 = vadd.s32 1, %v2343_v46  ;;  %v2339_v56 = vadd.s32 4294967169, %v1256_v54  ;;  %v1260_v3 = vor.u32 8388608, %v1259_v32  ;;  %v3330_v6 = vshll.u32 %v1364_v18, 8 }
 0x359   :  { %v1568_v7 = vshrl.u32 %v1567_v34, 23 }
 0x35a   :  { %vm1367_vm0 = vcmp.gt.s32.totalorder %v1366_v37, 0  ;;  %v1262_v43 = vadd.s32 1, %v2339_v56  ;;  %v3332_v13 = vshll.u32 %v1260_v3, 8 }
 0x35b   :  { %v1368_v50 = vsel %vm1367_vm0, %v1366_v37, 0  ;;  %v2351_v42 = vadd.s32 4294967169, %v1568_v7 }
 0x35c   :  { %v1369_v40 = vshrl.u32 %v1368_v50, 5  ;;  %v1370_v29 = vand.u32 31, %v1368_v50  ;;  %vm1263_vm1 = vcmp.gt.s32.totalorder %v1262_v43, 0 }
 0x35d   :  { %v1264_v19 = vsel %vm1263_vm1, %v1262_v43, 0  ;;  %v1574_v12 = vadd.s32 1, %v2351_v42 }
 0x35e   :  { %v1371_v26 = vsub.s32 32, %v1370_v29  ;;  %v1373_v31 = vshll.u32 %v2611_v59, %v1370_v29  ;;  %v1376_v58 = vshll.u32 %v2612_v62, %v1370_v29  ;;  %v1379_v41 = vshll.u32 %v2613_v0, %v1370_v29 }
 0x35f   :  { %v1382_v10 = vshll.u32 %v2614_v2, %v1370_v29  ;;  %v1385_v53 = vshll.u32 %v2615_v4, %v1370_v29  ;;  %vm1388_vm2 = vcmp.lt.s32.totalorder %v1369_v40, 1  ;;  %vm1389_vm3 = vcmp.lt.s32.totalorder %v1369_v40, 2 }
 0x360   :  { %v1374_v21 = vshrl.u32 %v2612_v62, %v1371_v26  ;;  %v1377_v25 = vshrl.u32 %v2613_v0, %v1371_v26  ;;  %v1380_v17 = vshrl.u32 %v2614_v2, %v1371_v26  ;;  %v1372_v44 = vshrl.u32 %v2611_v59, %v1371_v26 }
 0x361   :  { %v1383_v47 = vshrl.u32 %v2615_v4, %v1371_v26  ;;  %v1386_v52 = vshrl.u32 %v2616_v11, %v1371_v26  ;;  %vm1390_vm4 = vcmp.lt.s32.totalorder %v1369_v40, 3  ;;  %vm1391_vm5 = vcmp.lt.s32.totalorder %v1369_v40, 4 }
 0x362   :  { %v1375_v1 = vor.u32 %v1374_v21, %v1373_v31  ;;  %v1378_v55 = vor.u32 %v1377_v25, %v1376_v58  ;;  %v1381_v8 = vor.u32 %v1380_v17, %v1379_v41  ;;  %v1266_v38 = vand.u32 31, %v1264_v19 }
 0x363   :  { %v1384_v22 = vor.u32 %v1383_v47, %v1382_v10  ;;  %v1387_v30 = vor.u32 %v1386_v52, %v1385_v53  ;;  %v1265_v46 = vshrl.u32 %v1264_v19, 5  ;;  %vm1575_vm11 = vcmp.gt.s32.totalorder %v1574_v12, 0 }
 0x364   :  { %v1392_v49 = vsel %vm1388_vm2, %v1372_v44, %v1375_v1  ;;  %v1393_v20 = vsel %vm1391_vm5, %v1381_v8, 2102212464  ;;  %v1396_v5 = vsel %vm1388_vm2, %v1375_v1, %v1378_v55  ;;  %v1400_v63 = vsel %vm1388_vm2, %v1378_v55, %v1381_v8 }
 0x365   :  { %v1394_v23 = vsel %vm1390_vm4, %v1378_v55, %v1393_v20  ;;  %v1397_v39 = vsel %vm1391_vm5, %v1384_v22, 920167782  ;;  %v1401_v27 = vsel %vm1391_vm5, %v1387_v30, 1326507024  ;;  %v1267_v9 = vsub.s32 32, %v1266_v38 }
 0x366   :  { %v1395_v35 = vsel %vm1389_vm3, %v1392_v49, %v1394_v23  ;;  %v1398_v16 = vsel %vm1390_vm4, %v1381_v8, %v1397_v39  ;;  %v1402_v14 = vsel %vm1390_vm4, %v1384_v22, %v1401_v27  ;;  %v1269_v32 = vshll.u32 %v2611_v59, %v1266_v38 }
 0x367   :  { %v1399_v45 = vsel %vm1389_vm3, %v1396_v5, %v1398_v16  ;;  %v1403_v57 = vsel %vm1389_vm3, %v1400_v63, %v1402_v14  ;;  %v1411_v56 = vmul.u32 %v3330_v6, %v1395_v35  ;;  %v1270_v3 = vshrl.u32 %v2612_v62, %v1267_v9 }
 0x368   :  { %v3362_v54 = vmul.u32.u64.low %v3330_v6, %v1403_v57  ;;  %v3363_v34 = vmul.u32.u64.high %v3330_v6, %v1403_v57, %v3362_v54  ;;  %v3366_v37 = vmul.u32.u64.low %v3330_v6, %v1399_v45  ;;  %v3367_v18 = vmul.u32.u64.high %v3330_v6, %v1399_v45, %v3366_v37 }
 0x369   :  { %v1272_v7 = vshll.u32 %v2612_v62, %v1266_v38  ;;  %v1273_v33 = vshrl.u32 %v2613_v0, %v1267_v9  ;;  %v1275_v50 = vshll.u32 %v2613_v0, %v1266_v38  ;;  %v1276_v43 = vshrl.u32 %v2614_v2, %v1267_v9 }
 0x36a   :  { %v1278_v40 = vshll.u32 %v2614_v2, %v1266_v38  ;;  %v1279_v29 = vshrl.u32 %v2615_v4, %v1267_v9  ;;  %v1271_v42 = vor.u32 %v1270_v3, %v1269_v32  ;;  %v1281_v31 = vshll.u32 %v2615_v4, %v1266_v38 }
 0x36b   :  { %v1274_v26 = vor.u32 %v1273_v33, %v1272_v7  ;;  %v1282_v6 = vshrl.u32 %v2616_v11, %v1267_v9  ;;  %vm1413_vm6 = vc.u32 %v3363_v34, %v3366_v37  ;;  %v1414_v58 = vadd.s32 1, %v3367_v18 }
 0x36c   :  { %v1268_v60 = vshrl.u32 %v2611_v59, %v1267_v9  ;;  %v1277_v41 = vor.u32 %v1276_v43, %v1275_v50  ;;  %v1280_v10 = vor.u32 %v1279_v29, %v1278_v40  ;;  %vm1284_vm9 = vcmp.lt.s32.totalorder %v1265_v46, 1 }
 0x36d   :  { %v1283_v53 = vor.u32 %v1282_v6, %v1281_v31  ;;  %vm1285_vm7 = vcmp.lt.s32.totalorder %v1265_v46, 2  ;;  %v1415_v21 = vsel %vm1413_vm6, %v1414_v58, %v3367_v18  ;;  %vm1286_vm8 = vcmp.lt.s32.totalorder %v1265_v46, 3 }
 0x36e   :  { %vm1287_vm10 = vcmp.lt.s32.totalorder %v1265_v46, 4  ;;  %v1292_v25 = vsel %vm1284_vm9, %v1271_v42, %v1274_v26  ;;  %v1416_v17 = vadd.s32 %v1415_v21, %v1411_v56  ;;  %v1296_v52 = vsel %vm1284_vm9, %v1274_v26, %v1277_v41 }
 0x36f   :  { %v1289_v44 = vsel %vm1287_vm10, %v1277_v41, 2102212464  ;;  %v1293_v47 = vsel %vm1287_vm10, %v1280_v10, 920167782  ;;  %v1288_v1 = vsel %vm1284_vm9, %v1268_v60, %v1271_v42  ;;  %v1297_v8 = vsel %vm1287_vm10, %v1283_v53, 1326507024 }
 0x370   :  { %v1294_v55 = vsel %vm1286_vm8, %v1277_v41, %v1293_v47  ;;  %v1417_v19 = vadd.s32 536870912, %v1416_v17  ;;  %v1290_v22 = vsel %vm1286_vm8, %v1274_v26, %v1289_v44  ;;  %v1298_v38 = vsel %vm1286_vm8, %v1280_v10, %v1297_v8 }
 0x371   :  { %v1295_v30 = vsel %vm1285_vm7, %v1292_v25, %v1294_v55  ;;  %v1299_v49 = vsel %vm1285_vm7, %v1296_v52, %v1298_v38  ;;  %v1571_v63 = vand.u32 8388607, %v1564_v51  ;;  %v1576_v9 = vsel %vm1575_vm11, %v1574_v12, 0 }
 0x372   :  { %v3388_v20 = vmul.u32.u64.low %v3332_v13, %v1295_v30  ;;  %v3389_v5 = vmul.u32.u64.high %v3332_v13, %v1295_v30, %v3388_v20  ;;  %v3394_v23 = vshrl.u32 %v1417_v19, 30  ;;  %v1291_v35 = vsel %vm1285_vm7, %v1288_v1, %v1290_v22 }
 0x373   :  { %v3397_v39 = vmul.u32.u64.low %v3332_v13, %v1299_v49  ;;  %v3398_v27 = vmul.u32.u64.high %v3332_v13, %v1299_v49, %v3397_v39  ;;  %v1578_v16 = vand.u32 31, %v1576_v9  ;;  %v1572_v45 = vor.u32 8388608, %v1571_v63 }
 0x374   :  { %v1310_v14 = vadd.s32 1, %v3389_v5  ;;  %v1463_v32 = vand.u32 2139095040, %v3328_v24  ;;  %v1419_v54 = vshll.u32 %v3394_v23, 30  ;;  %v1307_v18 = vmul.u32 %v3332_v13, %v1291_v35 }
 0x375   :  { %v1579_v57 = vsub.s32 32, %v1578_v16  ;;  %vm1309_vm13 = vc.u32 %v3398_v27, %v3388_v20  ;;  %v1581_v56 = vshll.u32 %v2611_v59, %v1578_v16  ;;  %v1584_v3 = vshll.u32 %v2612_v62, %v1578_v16 }
 0x376   :  { %v1311_v12 = vsel %vm1309_vm13, %v1310_v14, %v3389_v5  ;;  %v1577_v50 = vshrl.u32 %v1576_v9, 5  ;;  %v1587_v43 = vshll.u32 %v2613_v0, %v1578_v16  ;;  %v1590_v42 = vshll.u32 %v2614_v2, %v1578_v16 }
 0x377   :  { %v1582_v46 = vshrl.u32 %v2612_v62, %v1579_v57  ;;  %v1585_v7 = vshrl.u32 %v2613_v0, %v1579_v57  ;;  %v1312_v33 = vadd.s32 %v1311_v12, %v1307_v18  ;;  %v1588_v40 = vshrl.u32 %v2614_v2, %v1579_v57 }
 0x378   :  { %v1591_v26 = vshrl.u32 %v2615_v4, %v1579_v57  ;;  %v1593_v58 = vshll.u32 %v2615_v4, %v1578_v16  ;;  %v1594_v60 = vshrl.u32 %v2616_v11, %v1579_v57  ;;  %v3418_v41 = vsub.s32 %v1416_v17, %v1419_v54 }
 0x379   :  { %v1583_v13 = vor.u32 %v1582_v46, %v1581_v56  ;;  %v1586_v29 = vor.u32 %v1585_v7, %v1584_v3  ;;  %v1313_v31 = vadd.s32 536870912, %v1312_v33  ;;  %v1589_v6 = vor.u32 %v1588_v40, %v1587_v43 }
 0x37a   :  { %v1592_v10 = vor.u32 %v1591_v26, %v1590_v42  ;;  %v1612_v53 = vshll.u32 %v1572_v45, 8  ;;  %v1464_v21 = vshrl.u32 %v1463_v32, 23  ;;  %v1595_v44 = vor.u32 %v1594_v60, %v1593_v58 }
 0x37b   :  { %v3420_v25 = vshrl.u32 %v1313_v31, 30  ;;  %vm1596_vm14 = vcmp.lt.s32.totalorder %v1577_v50, 1  ;;  %vm1599_vm15 = vcmp.lt.s32.totalorder %v1577_v50, 4  ;;  %vm1598_vm0 = vcmp.lt.s32.totalorder %v1577_v50, 3 }
 0x37c   :  { %v1601_v47 = vsel %vm1599_vm15, %v1589_v6, 2102212464  ;;  %v1604_v52 = vsel %vm1596_vm14, %v1583_v13, %v1586_v29  ;;  %v1605_v1 = vsel %vm1599_vm15, %v1592_v10, 920167782  ;;  %v1580_v8 = vshrl.u32 %v2611_v59, %v1579_v57 }
 0x37d   :  { %v1315_v55 = vshll.u32 %v3420_v25, 30  ;;  %vm1597_vm1 = vcmp.lt.s32.totalorder %v1577_v50, 2  ;;  %v1606_v19 = vsel %vm1598_vm0, %v1589_v6, %v1605_v1  ;;  %v1608_v22 = vsel %vm1596_vm14, %v1586_v29, %v1589_v6 }
 0x37e   :  { %v1607_v17 = vsel %vm1597_vm1, %v1604_v52, %v1606_v19  ;;  %v1609_v30 = vsel %vm1599_vm15, %v1595_v44, 1326507024  ;;  %v2347_v38 = vadd.s32 4294967169, %v1464_v21  ;;  %v1422_v49 = vsub.s32 0, %v3418_v41 }
 0x37f   :  { %v1600_v5 = vsel %vm1596_vm14, %v1580_v8, %v1583_v13  ;;  %v1602_v63 = vsel %vm1598_vm0, %v1586_v29, %v1601_v47  ;;  %v1610_v39 = vsel %vm1598_vm0, %v1592_v10, %v1609_v30  ;;  %v3426_v9 = vsub.s32 %v1312_v33, %v1315_v55 }
 0x380   :  { %v1611_v35 = vsel %vm1597_vm1, %v1608_v22, %v1610_v39  ;;  %v3429_v16 = vmul.u32.u64.low %v1612_v53, %v1607_v17  ;;  %v3430_v14 = vmul.u32.u64.high %v1612_v53, %v1607_v17, %v3429_v16  ;;  %v1470_v32 = vadd.s32 1, %v2347_v38 }
 0x381   :  { %v3433_v45 = vmul.u32.u64.low %v1612_v53, %v1611_v35  ;;  %v3434_v57 = vmul.u32.u64.high %v1612_v53, %v1611_v35, %v3433_v45  ;;  %v2344_v54 = vmin.u32 %v1422_v49, %v3418_v41  ;;  %v1603_v18 = vsel %vm1597_vm1, %v1600_v5, %v1602_v63 }
 0x382   :  { %v1460_v56 = vand.u32 2147483647, %v3328_v24  ;;  %v1318_v12 = vsub.s32 0, %v3426_v9  ;;  %v1622_v46 = vadd.s32 1, %v3430_v14  ;;  %vm1471_vm2 = vcmp.gt.s32.totalorder %v1470_v32, 0 }
 0x383   :  { %v1472_v3 = vsel %vm1471_vm2, %v1470_v32, 0  ;;  %v1619_v7 = vmul.u32 %v1612_v53, %v1603_v18  ;;  %vm1621_vm3 = vc.u32 %v3434_v57, %v3429_v16  ;;  %v1424_v43 = vclz %v2344_v54 }
 0x384   :  { %v1474_v33 = vand.u32 31, %v1472_v3  ;;  %v1623_v40 = vsel %vm1621_vm3, %v1622_v46, %v3430_v14  ;;  %v1467_v50 = vand.u32 8388607, %v1460_v56  ;;  %v2340_v13 = vmin.u32 %v1318_v12, %v3426_v9 }
 0x385   :  { %v1624_v29 = vadd.s32 %v1623_v40, %v1619_v7  ;;  %v2345_v31 = vadd.s32 4294967294, %v1424_v43  ;;  %v1473_v8 = vshrl.u32 %v1472_v3, 5  ;;  %vm1566_vm13 = vcmp.lt.s32.totalorder %v3323_v36, 0 }
 0x386   :  { %v1475_v42 = vsub.s32 32, %v1474_v33  ;;  %v1468_v6 = vor.u32 8388608, %v1467_v50  ;;  %v1320_v60 = vclz %v2340_v13  ;;  %v1477_v44 = vshll.u32 %v2611_v59, %v1474_v33 }
 0x387   :  { %v1625_v26 = vadd.s32 536870912, %v1624_v29  ;;  %v1480_v47 = vshll.u32 %v2612_v62, %v1474_v33  ;;  %v1486_v52 = vshll.u32 %v2614_v2, %v1474_v33  ;;  %v1483_v19 = vshll.u32 %v2613_v0, %v1474_v33 }
 0x388   :  { %v1478_v58 = vshrl.u32 %v2612_v62, %v1475_v42  ;;  %v1481_v53 = vshrl.u32 %v2613_v0, %v1475_v42  ;;  %v1484_v21 = vshrl.u32 %v2614_v2, %v1475_v42  ;;  %v1487_v1 = vshrl.u32 %v2615_v4, %v1475_v42 }
 0x389   :  { %v3448_v10 = vshrl.u32 %v1625_v26, 30  ;;  %v1489_v5 = vshll.u32 %v2615_v4, %v1474_v33  ;;  %v1490_v63 = vshrl.u32 %v2616_v11, %v1475_v42  ;;  %vm2346_vm4 = vcmp.lt.s32.totalorder %v2345_v31, 0 }
 0x38a   :  { %v1479_v17 = vor.u32 %v1478_v58, %v1477_v44  ;;  %v1482_v22 = vor.u32 %v1481_v53, %v1480_v47  ;;  %v1488_v30 = vor.u32 %v1487_v1, %v1486_v52  ;;  %v1485_v49 = vor.u32 %v1484_v21, %v1483_v19 }
 0x38b   :  { %v1627_v55 = vshll.u32 %v3448_v10, 30  ;;  %v2341_v39 = vadd.s32 4294967294, %v1320_v60  ;;  %v1508_v35 = vshll.u32 %v1468_v6, 8  ;;  %v1491_v45 = vor.u32 %v1490_v63, %v1489_v5 }
 0x38c   :  { %vm1492_vm5 = vcmp.lt.s32.totalorder %v1473_v8, 1  ;;  %vm1495_vm6 = vcmp.lt.s32.totalorder %v1473_v8, 4  ;;  %vm1493_vm9 = vcmp.lt.s32.totalorder %v1473_v8, 2  ;;  %vm1494_vm7 = vcmp.lt.s32.totalorder %v1473_v8, 3 }
 0x38d   :  { %v1628_v38 = vsub.s32 %v1624_v29, %v1627_v55  ;;  %v1500_v32 = vsel %vm1492_vm5, %v1479_v17, %v1482_v22  ;;  %v1501_v54 = vsel %vm1495_vm6, %v1488_v30, 920167782  ;;  %v1497_v12 = vsel %vm1495_vm6, %v1485_v49, 2102212464 }
 0x38e   :  { %v1502_v46 = vsel %vm1494_vm7, %v1485_v49, %v1501_v54  ;;  %v1504_v3 = vsel %vm1492_vm5, %v1482_v22, %v1485_v49  ;;  %v1427_v7 = vsel %vm2346_vm4, 0, %v2345_v31  ;;  %v1476_v33 = vshrl.u32 %v2611_v59, %v1475_v42 }
 0x38f   :  { %v1630_v14 = vsub.s32 0, %v1628_v38  ;;  %v1503_v43 = vsel %vm1493_vm9, %v1500_v32, %v1502_v46  ;;  %v1505_v40 = vsel %vm1495_vm6, %v1491_v45, 1326507024  ;;  %vm2342_vm8 = vcmp.lt.s32.totalorder %v2341_v39, 0 }
 0x390   :  { %v1506_v13 = vsel %vm1494_vm7, %v1488_v30, %v1505_v40  ;;  %v3466_v29 = vmul.u32.u64.low %v1508_v35, %v1503_v43  ;;  %v3467_v26 = vmul.u32.u64.high %v1508_v35, %v1503_v43, %v3466_v29  ;;  %v1496_v6 = vsel %vm1492_vm5, %v1476_v33, %v1479_v17 }
 0x391   :  { %v2352_v18 = vmin.u32 %v1630_v14, %v1628_v38  ;;  %v1498_v58 = vsel %vm1494_vm7, %v1482_v22, %v1497_v12  ;;  %v1507_v60 = vsel %vm1493_vm9, %v1504_v3, %v1506_v13  ;;  %v1432_v21 = vsub.s32 4294967266, %v1427_v7 }
 0x392   :  { %v3473_v53 = vmul.u32.u64.low %v1508_v35, %v1507_v60  ;;  %v3474_v42 = vmul.u32.u64.high %v1508_v35, %v1507_v60, %v3473_v53  ;;  %v1323_v44 = vsel %vm2342_vm8, 0, %v2341_v39  ;;  %v1499_v47 = vsel %vm1493_vm9, %v1496_v6, %v1498_v58 }
 0x393   :  { %v1632_v50 = vclz %v2352_v18  ;;  %v1518_v52 = vadd.s32 1, %v3467_v26  ;;  %v1620_v55 = vadd.s32 %v3429_v16, %v3434_v57  ;;  %v1433_v22 = vadd.s32 127, %v1432_v21 }
 0x394   :  { %v1328_v30 = vsub.s32 4294967266, %v1323_v44  ;;  %v1515_v49 = vmul.u32 %v1508_v35, %v1499_v47  ;;  %vm1517_vm11 = vc.u32 %v3474_v42, %v3466_v29  ;;  %v1428_v45 = vsub.s32 32, %v1427_v7 }
 0x395   :  { %v2353_v31 = vadd.s32 4294967294, %v1632_v50  ;;  %v1519_v8 = vsel %vm1517_vm11, %v1518_v52, %v3467_v26  ;;  %v1412_v16 = vadd.s32 %v3366_v37, %v3363_v34  ;;  %v1434_v57 = vshll.u32 %v1433_v22, 23 }
 0x396   :  { %v1520_v14 = vadd.s32 %v1519_v8, %v1515_v49  ;;  %v1329_v18 = vadd.s32 127, %v1328_v30  ;;  %v1324_v35 = vsub.s32 32, %v1323_v44  ;;  %v1308_v40 = vadd.s32 %v3388_v20, %v3398_v27 }
 0x397   :  { %vm2354_vm10 = vcmp.lt.s32.totalorder %v2353_v31, 0  ;;  %v1430_v33 = vshrl.u32 %v1412_v16, %v1428_v45  ;;  %v1429_v26 = vshll.u32 %v3418_v41, %v1427_v7  ;;  %v1435_v6 = vor.u32 4788187, %v1434_v57 }
 0x398   :  { %v1635_v1 = vsel %vm2354_vm10, 0, %v2353_v31  ;;  %v1521_v12 = vadd.s32 536870912, %v1520_v14  ;;  %v1330_v50 = vshll.u32 %v1329_v18, 23  ;;  %v1326_v60 = vshrl.u32 %v1308_v40, %v1324_v35 }
 0x399   :  { %v1636_v19 = vsub.s32 32, %v1635_v1  ;;  %v1640_v17 = vsub.s32 4294967266, %v1635_v1  ;;  %v1637_v5 = vshll.u32 %v1628_v38, %v1635_v1  ;;  %v1431_v37 = vor.u32 %v1430_v33, %v1429_v26 }
 0x39a   :  { %v3485_v3 = vshrl.u32 %v1521_v12, 30  ;;  %v1325_v53 = vshll.u32 %v3426_v9, %v1323_v44  ;;  %v1331_v21 = vor.u32 4788187, %v1330_v50  ;;  %v1650_v52 = vsub.s32 4, %v3448_v10 }
 0x39b   :  { %v1638_v63 = vshrl.u32 %v1620_v55, %v1636_v19  ;;  %v1641_v39 = vadd.s32 127, %v1640_v17  ;;  %v1436_v20 = vand.u32 2147483647, %v1435_v6  ;;  %vm3498_vm14 = vcmp.le.f32.partialorder %v1564_v51, 0.7853982 }
 0x39c   :  { %v1523_v13 = vshll.u32 %v3485_v3, 30  ;;  %v1327_v7 = vor.u32 %v1326_v60, %v1325_v53  ;;  %v1438_v44 = vcvt.s32.f32 %v1431_v37  ;;  %v1332_v55 = vand.u32 2147483647, %v1331_v21 }
 0x39d   :  { %v1639_v32 = vor.u32 %v1638_v63, %v1637_v5  ;;  %v1642_v54 = vshll.u32 %v1641_v39, 23  ;;  %v1651_v17 = vsel %vm1566_vm13, %v1650_v52, %v3448_v10  ;;  %v1516_v8 = vadd.s32 %v3466_v29, %v3474_v42 }
 0x39e   :  { %v1524_v34 = vsub.s32 %v1520_v14, %v1523_v13  ;;  %v1439_v22 = vmul.f32 %v1438_v44, %v1436_v20  ;;  %v1334_v51 = vcvt.s32.f32 %v1327_v7  ;;  %v1653_v49 = vsel %vm3498_vm14, 0, %v1651_v17 }
 0x39f   :  { %v1643_v46 = vor.u32 4788187, %v1642_v54  ;;  %v1646_v43 = vcvt.s32.f32 %v1639_v32  ;;  %v1657_v32 = vadd.s32 3, %v1653_v49  ;;  %vm1358_vm0 = vcmp.lt.s32.totalorder %v3313_v61, 0 }
 0x3a0   :  { %v1526_v47 = vsub.s32 0, %v1524_v34  ;;  %v1335_v5 = vmul.f32 %v1334_v51, %v1332_v55  ;;  %v1440_v63 = vxor.u32 2147483648, %v1439_v22  ;;  %vm1254_vm1 = vcmp.lt.s32.totalorder %v3317_v28, 0 }
 0x3a1   :  { %v1644_v38 = vand.u32 2147483647, %v1643_v46  ;;  %v1658_v35 = vand.u32 3, %v1657_v32  ;;  %vm3520_vm2 = vcmp.le.f32.partialorder %v1356_v48, 0.7853982  ;;  %vm1656_vm9 = vweird.f32 %v3323_v36 }
 0x3a2   :  { %v2348_v1 = vmin.u32 %v1526_v47, %v1524_v34  ;;  %v1336_v54 = vxor.u32 2147483648, %v1335_v5  ;;  %v1441_v16 = vsel %vm1358_vm0, %v1440_v63, %v1439_v22  ;;  %vm3529_vm3 = vcmp.le.f32.partialorder %v1252_v15, 0.7853982 }
 0x3a3   :  { %v1647_v58 = vmul.f32 %v1646_v43, %v1644_v38  ;;  %v1444_v50 = vsel %vm3520_vm2, %v3313_v61, %v1441_v16  ;;  %vm1663_vm4 = vcmp.eq.s32.totalorder %v1658_v35, 2  ;;  %vm1660_vm5 = vcmp.eq.s32.totalorder %v1658_v35, 0 }
 0x3a4   :  { %v1528_v19 = vclz %v2348_v1  ;;  %v1337_v29 = vsel %vm1254_vm1, %v1336_v54, %v1335_v5  ;;  %vm1659_vm6 = vcmp.lt.s32.totalorder %v1658_v35, 2  ;;  %v1442_v21 = vsub.s32 4, %v3394_v23 }
 0x3a5   :  { %v1648_v31 = vxor.u32 2147483648, %v1647_v58  ;;  %v1340_v60 = vsel %vm3529_vm3, %v3317_v28, %v1337_v29  ;;  %vm1462_vm7 = vcmp.lt.s32.totalorder %v3328_v24, 0  ;;  %v1546_v47 = vsub.s32 4, %v3485_v3 }
 0x3a6   :  { %v2349_v30 = vadd.s32 4294967294, %v1528_v19  ;;  %vm1461_vm8 = vcmp.le.f32.partialorder %v1460_v56, 0.7853982 }
 0x3a7   :  { %v1649_v27 = vsel %vm1566_vm13, %v1648_v31, %v1647_v58  ;;  %v1547_v41 = vsel %vm1462_vm7, %v1546_v47, %v3485_v3 }
 0x3a8   :  { %v1652_v9 = vsel %vm3498_vm14, %v3323_v36, %v1649_v27  ;;  %vm2350_vm15 = vcmp.lt.s32.totalorder %v2349_v30, 0  ;;  %v1338_v36 = vsub.s32 4, %v3420_v25  ;;  %v1443_v27 = vsel %vm1358_vm0, %v1442_v21, %v3394_v23 }
 0x3a9   :  { %2578 = vcosq.f32 %v1652_v9  ;;  %v1531_v39 = vsel %vm2350_vm15, 0, %v2349_v30  ;;  %v1445_v1 = vsel %vm3520_vm2, 0, %v1443_v27  ;;  %v1549_v56 = vsel %vm1461_vm8, 0, %v1547_v41 }
 0x3aa   :  { %2580 = vsinq.f32 %v1652_v9  ;;  %v1532_v14 = vsub.s32 32, %v1531_v39  ;;  %v1536_v45 = vsub.s32 4294967266, %v1531_v39  ;;  %v1533_v18 = vshll.u32 %v1524_v34, %v1531_v39 }
 0x3ab   :  { %2582 = vcosq.f32 %v1444_v50  ;;  %v1339_v7 = vsel %vm1254_vm1, %v1338_v36, %v3420_v25  ;;  %v1449_v44 = vadd.s32 3, %v1445_v1  ;;  %v1553_v19 = vadd.s32 3, %v1549_v56 }
 0x3ac   :  { %v1534_v10 = vshrl.u32 %v1516_v8, %v1532_v14  ;;  %v1537_v12 = vadd.s32 127, %v1536_v45  ;;  %2584 = vsinq.f32 %v1444_v50  ;;  %v1341_v9 = vsel %vm3529_vm3, 0, %v1339_v7  ;;  %v1689_v50 = vpop.permute.xlu1 %1688 }
 0x3ad   :  { %2586 = vcosq.f32 %v1340_v60  ;;  %v1345_v22 = vadd.s32 3, %v1341_v9  ;;  %v1450_v3 = vand.u32 3, %v1449_v44  ;;  %v1554_v30 = vand.u32 3, %v1553_v19 }
 0x3ae   :  { %v1535_v57 = vor.u32 %v1534_v10, %v1533_v18  ;;  %v1538_v46 = vshll.u32 %v1537_v12, 23  ;;  %2588 = vsinq.f32 %v1340_v60  ;;  %vm1552_vm3 = vweird.f32 %v3328_v24 }
 0x3af   :  { %v1346_v63 = vand.u32 3, %v1345_v22  ;;  %vm1451_vm10 = vcmp.lt.s32.totalorder %v1450_v3, 2  ;;  %vm1452_vm11 = vcmp.eq.s32.totalorder %v1450_v3, 0  ;;  %vm1455_vm13 = vcmp.eq.s32.totalorder %v1450_v3, 2 }
 0x3b0   :  { %v1539_v42 = vor.u32 4788187, %v1538_v46  ;;  %v1542_v6 = vcvt.s32.f32 %v1535_v57  ;;  %vm1559_vm14 = vcmp.eq.s32.totalorder %v1554_v30, 2  ;;  %vm1556_vm15 = vcmp.eq.s32.totalorder %v1554_v30, 0 }
 0x3b1   :  { %vm1348_vm0 = vcmp.eq.s32.totalorder %v1346_v63, 0  ;;  %vm1351_vm1 = vcmp.eq.s32.totalorder %v1346_v63, 2  ;;  %vm1555_vm2 = vcmp.lt.s32.totalorder %v1554_v30, 2 }
 0x3b2   :  { %v1540_v26 = vand.u32 2147483647, %v1539_v42 }
 0x3b4   :  { %v1543_v34 = vmul.f32 %v1542_v6, %v1540_v26 }
 0x3b6   :  { %v2579_v33 = vpop.eup %2578  ;;  %v1544_v31 = vxor.u32 2147483648, %v1543_v34 }
 0x3b7   :  { %v2581_v43 = vpop.eup %2580  ;;  %v1664_v40 = vxor.u32 2147483648, %v2579_v33 }
 0x3b8   :  { %v1661_v58 = vxor.u32 2147483648, %v2581_v43  ;;  %v1545_v52 = vsel %vm1462_vm7, %v1544_v31, %v1543_v34  ;;  %v2583_v55 = vpop.eup %2582 }
 0x3b9   :  { %v1665_v48 = vsel %vm1663_vm4, %v1664_v40, %v2581_v43  ;;  %v1548_v20 = vsel %vm1461_vm8, %v3328_v24, %v1545_v52  ;;  %v2585_v17 = vpop.eup %2584  ;;  %v1456_v5 = vxor.u32 2147483648, %v2583_v55  ;;  %vm1347_vm4 = vcmp.lt.s32.totalorder %v1346_v63, 2  ;;  %v1669_v24 = vld [vmem:[%s3842_s7 + $0x8] sm:$0xff]  ;;  %v1670_v43 = vld [vmem:[%s3842_s7 + $0x10] sm:$0xff]  ;;  %v1694_v40 = vpop.permute.xlu0 %1693 }
 0x3ba   :  { %v1662_v37 = vsel %vm1660_vm5, %v2579_v33, %v1661_v58  ;;  %2590 = vcosq.f32 %v1548_v20  ;;  %v2587_v23 = vpop.eup %2586  ;;  %v1453_v49 = vxor.u32 2147483648, %v2585_v17  ;;  %vm1448_vm5 = vweird.f32 %v3313_v61  ;;  %v1671_v61 = vld [vmem:[%s3842_s7 + $0x18] sm:$0xff]  ;;  %v1679_v58 = vpop.permute.xlu1 %1678 }
 0x3bb   :  { %v1666_v15 = vsel %vm1659_vm6, %v1662_v37, %v1665_v48  ;;  %2592 = vsinq.f32 %v1548_v20  ;;  %v2589_v51 = vpop.eup %2588  ;;  %v1352_v8 = vxor.u32 2147483648, %v2587_v23  ;;  %v1457_v18 = vsel %vm1455_vm13, %v1456_v5, %v2585_v17 }
 0x3bc   :  { %v1667_v53 = vsel %vm1656_vm9, nan, %v1666_v15  ;;  %v1349_v39 = vxor.u32 2147483648, %v2589_v51  ;;  %v1454_v54 = vsel %vm1452_vm11, %v2583_v55, %v1453_v49  ;;  %vm1344_vm6 = vweird.f32 %v3317_v28 }
 0x3bd   :  { %2446 = vmatprep.subr.mxu1 %v1667_v53  ;;  %v1353_v57 = vsel %vm1351_vm1, %v1352_v8, %v2589_v51  ;;  %v1458_v35 = vsel %vm1451_vm10, %v1454_v54, %v1457_v18  ;;  %v2617_v28 = vmov 0.0   ;;  %v1684_v13 = vpop.permute.xlu0 %1683 }
 0x3be   :  { %2447 = vmatpush3.msra.mxu1 %v1667_v53  ;;  %v1350_v16 = vsel %vm1348_vm0, %v2587_v23, %v1349_v39  ;;  %v1459_v42 = vsel %vm1448_vm5, nan, %v1458_v35  ;;  %2460 = vmatprep.subr.mxu0 %v2617_v28 }
 0x3bf   :  { %v1354_v29 = vsel %vm1347_vm4, %v1350_v16, %v1353_v57 }
 0x3c0   :  { %v1355_v38 = vsel %vm1344_vm6, nan, %v1354_v29 }
 0x3c7   :  { %v2591_v25 = vpop.eup %2590 }
 0x3c8   :  { %v2593_v14 = vpop.eup %2592  ;;  %v1560_v45 = vxor.u32 2147483648, %v2591_v25 }
 0x3c9   :  { %v1557_v32 = vxor.u32 2147483648, %v2593_v14 }
 0x3ca   :  { %v1561_v10 = vsel %vm1559_vm14, %v1560_v45, %v2593_v14 }
 0x3cb   :  { %v1558_v12 = vsel %vm1556_vm15, %v2591_v25, %v1557_v32 }
 0x3cc   :  { %v1562_v46 = vsel %vm1555_vm2, %v1558_v12, %v1561_v10 }
 0x3cd   :  { %v1563_v33 = vsel %vm1552_vm3, nan, %v1562_v46 }
 0x3ce   :  { %2448 = vmatprep.subr.mxu1 %v1563_v33 }
 0x3cf   :  { %2449 = vmatpush3.msra.mxu1 %v1563_v33 }
 0x3d0   :  { %2450 = vmatprep.subr.mxu1 %v1459_v42 }
 0x3d1   :  { %2451 = vmatpush3.msra.mxu1 %v1459_v42 }
 0x3d2   :  { %2452 = vmatprep.subr.mxu1 %v1355_v38 }
 0x3d3   :  { %2453 = vmatpush3.msra.mxu1 %v1355_v38 }
 0x3d4   :  { %2455 = vmatmul.mubr.msk.f32.vlgmr.msra.gmra.mxu1 %vm613_vm12, %v1669_v24 }
 0x3d5   :  { %2457 = vmatprep.mubr.msk.f32.mxu1 %vm613_vm12, %v1670_v43 }
 0x3d8   :  { %2458 = vmatmul.mubr.msk.f32.gmra.mxu1 %vm613_vm12, %v1671_v61 }
 0x494   :  { %v2456_v26 = vpop.f32.mrf.mxu1 }
 0x495   :  { %v3572_v6 = vadd.f32 %v2456_v26, %v1684_v13 }
 0x496   :  { %v1774_v48 = vpop.f32.mrf.mxu1 }
 0x497   :  { %v1897_v60 = vand.u32 2147483647, %v3572_v6  ;;  %v1900_v34 = vand.u32 2139095040, %v3572_v6  ;;  %v3576_v37 = vadd.f32 %v1774_v48, %v1679_v58 }
 0x498   :  { %v2459_v15 = vpop.f32.mrf.mxu1 }
 0x499   :  { %v1901_v31 = vshrl.u32 %v1900_v34, 23  ;;  %v1904_v53 = vand.u32 8388607, %v1897_v60  ;;  %v1793_v21 = vand.u32 2147483647, %v3576_v37  ;;  %v1796_v47 = vand.u32 2139095040, %v3576_v37 }
 0x49a   :  { %v3582_v52 = vadd.f32 %v2459_v15, %v1694_v40  ;;  %v1784_v44 = vpop.f32.mrf.mxu1 }
 0x49b   :  { %v2363_v36 = vadd.s32 4294967169, %v1901_v31  ;;  %v1797_v20 = vshrl.u32 %v1796_v47, 23  ;;  %v1800_v27 = vand.u32 8388607, %v1793_v21  ;;  %v1905_v7 = vor.u32 8388608, %v1904_v53 }
 0x49c   :  { %v2108_v9 = vand.u32 2139095040, %v3582_v52  ;;  %v3587_v23 = vadd.f32 %v1784_v44, %v1689_v50  ;;  %v2105_v30 = vand.u32 2147483647, %v3582_v52 }
 0x49d   :  { %v1907_v41 = vadd.s32 1, %v2363_v36  ;;  %v2359_v1 = vadd.s32 4294967169, %v1797_v20  ;;  %v1801_v56 = vor.u32 8388608, %v1800_v27  ;;  %v3589_v51 = vshll.u32 %v1905_v7, 8 }
 0x49e   :  { %v2109_v49 = vshrl.u32 %v2108_v9, 23 }
 0x49f   :  { %vm1908_vm9 = vcmp.gt.s32.totalorder %v1907_v41, 0  ;;  %v1803_v19 = vadd.s32 1, %v2359_v1  ;;  %v3591_v3 = vshll.u32 %v1801_v56, 8 }
 0x4a0   :  { %v1909_v55 = vsel %vm1908_vm9, %v1907_v41, 0  ;;  %v2371_v15 = vadd.s32 4294967169, %v2109_v49 }
 0x4a1   :  { %v1910_v17 = vshrl.u32 %v1909_v55, 5  ;;  %v1911_v22 = vand.u32 31, %v1909_v55  ;;  %vm1804_vm7 = vcmp.gt.s32.totalorder %v1803_v19, 0 }
 0x4a2   :  { %v1805_v35 = vsel %vm1804_vm7, %v1803_v19, 0 }
 0x4a3   :  { %v1912_v5 = vsub.s32 32, %v1911_v22  ;;  %v1914_v63 = vshll.u32 %v2611_v59, %v1911_v22  ;;  %v1917_v25 = vshll.u32 %v2612_v62, %v1911_v22  ;;  %v1920_v39 = vshll.u32 %v2613_v0, %v1911_v22 }
 0x4a4   :  { %v1923_v8 = vshll.u32 %v2614_v2, %v1911_v22  ;;  %v1926_v14 = vshll.u32 %v2615_v4, %v1911_v22  ;;  %vm1929_vm8 = vcmp.lt.s32.totalorder %v1910_v17, 1  ;;  %vm1930_vm10 = vcmp.lt.s32.totalorder %v1910_v17, 2 }
 0x4a5   :  { %v1915_v45 = vshrl.u32 %v2612_v62, %v1912_v5  ;;  %v1918_v32 = vshrl.u32 %v2613_v0, %v1912_v5  ;;  %v1921_v54 = vshrl.u32 %v2614_v2, %v1912_v5  ;;  %v1913_v18 = vshrl.u32 %v2611_v59, %v1912_v5 }
 0x4a6   :  { %v1924_v10 = vshrl.u32 %v2615_v4, %v1912_v5  ;;  %v1927_v12 = vshrl.u32 %v2616_v11, %v1912_v5  ;;  %vm1931_vm11 = vcmp.lt.s32.totalorder %v1910_v17, 3  ;;  %vm1932_vm13 = vcmp.lt.s32.totalorder %v1910_v17, 4 }
 0x4a7   :  { %v1916_v16 = vor.u32 %v1915_v45, %v1914_v63  ;;  %v1919_v57 = vor.u32 %v1918_v32, %v1917_v25  ;;  %v1922_v46 = vor.u32 %v1921_v54, %v1920_v39  ;;  %v1807_v42 = vand.u32 31, %v1805_v35 }
 0x4a8   :  { %v1925_v33 = vor.u32 %v1924_v10, %v1923_v8  ;;  %v1928_v29 = vor.u32 %v1927_v12, %v1926_v14  ;;  %v1806_v47 = vshrl.u32 %v1805_v35, 5 }
 0x4a9   :  { %v1933_v38 = vsel %vm1929_vm8, %v1913_v18, %v1916_v16  ;;  %v1934_v24 = vsel %vm1932_vm13, %v1922_v46, 2102212464  ;;  %v1937_v43 = vsel %vm1929_vm8, %v1916_v16, %v1919_v57  ;;  %v1941_v61 = vsel %vm1929_vm8, %v1919_v57, %v1922_v46 }
 0x4aa   :  { %v1935_v40 = vsel %vm1931_vm11, %v1919_v57, %v1934_v24  ;;  %v1938_v50 = vsel %vm1932_vm13, %v1925_v33, 920167782  ;;  %v1942_v13 = vsel %vm1932_vm13, %v1928_v29, 1326507024  ;;  %v1808_v26 = vsub.s32 32, %v1807_v42 }
 0x4ab   :  { %v1936_v58 = vsel %vm1930_vm10, %v1933_v38, %v1935_v40  ;;  %v1939_v48 = vsel %vm1931_vm11, %v1922_v46, %v1938_v50  ;;  %v1943_v34 = vsel %vm1931_vm11, %v1925_v33, %v1942_v13  ;;  %v1810_v36 = vshll.u32 %v2611_v59, %v1807_v42 }
 0x4ac   :  { %v1940_v31 = vsel %vm1930_vm10, %v1937_v43, %v1939_v48  ;;  %v1944_v53 = vsel %vm1930_vm10, %v1941_v61, %v1943_v34  ;;  %v1952_v1 = vmul.u32 %v3589_v51, %v1936_v58  ;;  %v1811_v56 = vshrl.u32 %v2612_v62, %v1808_v26 }
 0x4ad   :  { %v3617_v20 = vmul.u32.u64.low %v3589_v51, %v1944_v53  ;;  %v3618_v27 = vmul.u32.u64.high %v3589_v51, %v1944_v53, %v3617_v20  ;;  %v3621_v41 = vmul.u32.u64.low %v3589_v51, %v1940_v31  ;;  %v3622_v7 = vmul.u32.u64.high %v3589_v51, %v1940_v31, %v3621_v41 }
 0x4ae   :  { %v1813_v9 = vshll.u32 %v2612_v62, %v1807_v42  ;;  %v1814_v44 = vshrl.u32 %v2613_v0, %v1808_v26  ;;  %v1816_v55 = vshll.u32 %v2613_v0, %v1807_v42  ;;  %v1817_v19 = vshrl.u32 %v2614_v2, %v1808_v26 }
 0x4af   :  { %v1819_v17 = vshll.u32 %v2614_v2, %v1807_v42  ;;  %v1820_v22 = vshrl.u32 %v2615_v4, %v1808_v26  ;;  %v1812_v49 = vor.u32 %v1811_v56, %v1810_v36  ;;  %v1822_v63 = vshll.u32 %v2615_v4, %v1807_v42 }
 0x4b0   :  { %v1815_v5 = vor.u32 %v1814_v44, %v1813_v9  ;;  %v1823_v51 = vshrl.u32 %v2616_v11, %v1808_v26  ;;  %vm1954_vm14 = vc.u32 %v3618_v27, %v3621_v41  ;;  %v1955_v25 = vadd.s32 1, %v3622_v7 }
 0x4b1   :  { %v1809_v39 = vshrl.u32 %v2611_v59, %v1808_v26  ;;  %v1818_v8 = vor.u32 %v1817_v19, %v1816_v55  ;;  %v1821_v14 = vor.u32 %v1820_v22, %v1819_v17  ;;  %vm1825_vm15 = vcmp.lt.s32.totalorder %v1806_v47, 1 }
 0x4b2   :  { %v1824_v45 = vor.u32 %v1823_v51, %v1822_v63  ;;  %vm1826_vm0 = vcmp.lt.s32.totalorder %v1806_v47, 2  ;;  %v1956_v32 = vsel %vm1954_vm14, %v1955_v25, %v3622_v7  ;;  %vm1827_vm1 = vcmp.lt.s32.totalorder %v1806_v47, 3 }
 0x4b3   :  { %vm1828_vm2 = vcmp.lt.s32.totalorder %v1806_v47, 4  ;;  %v1833_v54 = vsel %vm1825_vm15, %v1812_v49, %v1815_v5  ;;  %v1957_v18 = vadd.s32 %v1956_v32, %v1952_v1  ;;  %v1837_v16 = vsel %vm1825_vm15, %v1815_v5, %v1818_v8 }
 0x4b4   :  { %v1830_v10 = vsel %vm1828_vm2, %v1818_v8, 2102212464  ;;  %v1834_v12 = vsel %vm1828_vm2, %v1821_v14, 920167782  ;;  %v1829_v57 = vsel %vm1825_vm15, %v1809_v39, %v1812_v49  ;;  %v1838_v35 = vsel %vm1828_vm2, %v1824_v45, 1326507024 }
 0x4b5   :  { %v1835_v46 = vsel %vm1827_vm1, %v1818_v8, %v1834_v12  ;;  %v2115_v33 = vadd.s32 1, %v2371_v15  ;;  %v1958_v29 = vadd.s32 536870912, %v1957_v18  ;;  %v1831_v42 = vsel %vm1827_vm1, %v1815_v5, %v1830_v10 }
 0x4b6   :  { %v1836_v38 = vsel %vm1826_vm0, %v1833_v54, %v1835_v46  ;;  %v1839_v24 = vsel %vm1827_vm1, %v1821_v14, %v1838_v35  ;;  %v2004_v50 = vand.u32 2139095040, %v3587_v23  ;;  %v1832_v48 = vsel %vm1826_vm0, %v1829_v57, %v1831_v42 }
 0x4b7   :  { %v1840_v43 = vsel %vm1826_vm0, %v1837_v16, %v1839_v24  ;;  %v3643_v61 = vmul.u32.u64.low %v3591_v3, %v1836_v38  ;;  %v3644_v40 = vmul.u32.u64.high %v3591_v3, %v1836_v38, %v3643_v61  ;;  %v3648_v13 = vshrl.u32 %v1958_v29, 30 }
 0x4b8   :  { %v3651_v26 = vmul.u32.u64.low %v3591_v3, %v1840_v43  ;;  %v3652_v58 = vmul.u32.u64.high %v3591_v3, %v1840_v43, %v3651_v26  ;;  %vm2116_vm3 = vcmp.gt.s32.totalorder %v2115_v33, 0  ;;  %v2112_v36 = vand.u32 8388607, %v2105_v30 }
 0x4b9   :  { %v2117_v34 = vsel %vm2116_vm3, %v2115_v33, 0  ;;  %v1960_v15 = vshll.u32 %v3648_v13, 30  ;;  %v1851_v53 = vadd.s32 1, %v3644_v40  ;;  %v1848_v20 = vmul.u32 %v3591_v3, %v1832_v48 }
 0x4ba   :  { %v2119_v31 = vand.u32 31, %v2117_v34  ;;  %vm1850_vm4 = vc.u32 %v3652_v58, %v3643_v61  ;;  %v2005_v1 = vshrl.u32 %v2004_v50, 23  ;;  %v2118_v9 = vshrl.u32 %v2117_v34, 5 }
 0x4bb   :  { %v3662_v56 = vsub.s32 %v1957_v18, %v1960_v15  ;;  %v1852_v47 = vsel %vm1850_vm4, %v1851_v53, %v3644_v40  ;;  %v2113_v18 = vor.u32 8388608, %v2112_v36  ;;  %vm2618_vm3 = vmmov 0  }
 0x4bc   :  { %v2120_v7 = vsub.s32 32, %v2119_v31  ;;  %v2122_v44 = vshll.u32 %v2611_v59, %v2119_v31  ;;  %v1853_v55 = vadd.s32 %v1852_v47, %v1848_v20  ;;  %v2125_v17 = vshll.u32 %v2612_v62, %v2119_v31  ;;  %2468 = vmatprep.mubr.msk.f32.mxu0 %vm2618_vm3, %v2617_v28 }
 0x4bd   :  { %v2128_v22 = vshll.u32 %v2613_v0, %v2119_v31  ;;  %v2131_v5 = vshll.u32 %v2614_v2, %v2119_v31  ;;  %v2134_v39 = vshll.u32 %v2615_v4, %v2119_v31  ;;  %v1963_v10 = vsub.s32 0, %v3662_v56 }
 0x4be   :  { %v2123_v19 = vshrl.u32 %v2612_v62, %v2120_v7  ;;  %v2126_v3 = vshrl.u32 %v2613_v0, %v2120_v7  ;;  %v2129_v49 = vshrl.u32 %v2614_v2, %v2120_v7  ;;  %v2132_v63 = vshrl.u32 %v2615_v4, %v2120_v7 }
 0x4bf   :  { %v1854_v51 = vadd.s32 536870912, %v1853_v55  ;;  %v2135_v32 = vshrl.u32 %v2616_v11, %v2120_v7  ;;  %vm2137_vm5 = vcmp.lt.s32.totalorder %v2118_v9, 1  ;;  %v2367_v16 = vadd.s32 4294967169, %v2005_v1 }
 0x4c0   :  { %v2124_v25 = vor.u32 %v2123_v19, %v2122_v44  ;;  %v2127_v8 = vor.u32 %v2126_v3, %v2125_v17  ;;  %v2130_v14 = vor.u32 %v2129_v49, %v2128_v22  ;;  %v2133_v45 = vor.u32 %v2132_v63, %v2131_v5 }
 0x4c1   :  { %v3675_v54 = vshrl.u32 %v1854_v51, 30  ;;  %v2136_v12 = vor.u32 %v2135_v32, %v2134_v39  ;;  %vm2139_vm6 = vcmp.lt.s32.totalorder %v2118_v9, 3  ;;  %vm2140_vm9 = vcmp.lt.s32.totalorder %v2118_v9, 4 }
 0x4c2   :  { %v2145_v46 = vsel %vm2137_vm5, %v2124_v25, %v2127_v8  ;;  %v2121_v35 = vshrl.u32 %v2611_v59, %v2120_v7  ;;  %v2142_v33 = vsel %vm2140_vm9, %v2130_v14, 2102212464  ;;  %v2146_v29 = vsel %vm2140_vm9, %v2133_v45, 920167782 }
 0x4c3   :  { %v1856_v57 = vshll.u32 %v3675_v54, 30  ;;  %v2150_v42 = vsel %vm2140_vm9, %v2136_v12, 1326507024  ;;  %vm2138_vm7 = vcmp.lt.s32.totalorder %v2118_v9, 2  ;;  %v2147_v24 = vsel %vm2139_vm6, %v2130_v14, %v2146_v29 }
 0x4c4   :  { %v2149_v43 = vsel %vm2137_vm5, %v2127_v8, %v2130_v14  ;;  %v2148_v40 = vsel %vm2138_vm7, %v2145_v46, %v2147_v24  ;;  %v2151_v50 = vsel %vm2139_vm6, %v2133_v45, %v2150_v42  ;;  %v2153_v26 = vshll.u32 %v2113_v18, 8 }
 0x4c5   :  { %v3681_v38 = vsub.s32 %v1853_v55, %v1856_v57  ;;  %v2141_v48 = vsel %vm2137_vm5, %v2121_v35, %v2124_v25  ;;  %v2143_v34 = vsel %vm2139_vm6, %v2127_v8, %v2142_v33  ;;  %v2152_v15 = vsel %vm2138_vm7, %v2149_v43, %v2151_v50 }
 0x4c6   :  { %v3687_v31 = vmul.u32.u64.low %v2153_v26, %v2148_v40  ;;  %v3688_v53 = vmul.u32.u64.high %v2153_v26, %v2148_v40, %v3687_v31  ;;  %v2011_v36 = vadd.s32 1, %v2367_v16  ;;  %v2364_v20 = vmin.u32 %v1963_v10, %v3662_v56 }
 0x4c7   :  { %v1859_v7 = vsub.s32 0, %v3681_v38  ;;  %v3693_v1 = vmul.u32.u64.low %v2153_v26, %v2152_v15  ;;  %v3694_v47 = vmul.u32.u64.high %v2153_v26, %v2152_v15, %v3693_v1  ;;  %v2144_v44 = vsel %vm2138_vm7, %v2141_v48, %v2143_v34 }
 0x4c8   :  { %vm2012_vm8 = vcmp.gt.s32.totalorder %v2011_v36, 0  ;;  %v2001_v55 = vand.u32 2147483647, %v3587_v23  ;;  %v2163_v17 = vadd.s32 1, %v3688_v53  ;;  %v1965_v3 = vclz %v2364_v20 }
 0x4c9   :  { %v2013_v19 = vsel %vm2012_vm8, %v2011_v36, 0  ;;  %v2360_v49 = vmin.u32 %v1859_v7, %v3681_v38  ;;  %v2160_v5 = vmul.u32 %v2153_v26, %v2144_v44  ;;  %vm2162_vm10 = vc.u32 %v3694_v47, %v3687_v31 }
 0x4ca   :  { %v2015_v22 = vand.u32 31, %v2013_v19  ;;  %v2164_v51 = vsel %vm2162_vm10, %v2163_v17, %v3688_v53  ;;  %v2008_v9 = vand.u32 8388607, %v2001_v55  ;;  %v2365_v39 = vadd.s32 4294967294, %v1965_v3 }
 0x4cb   :  { %v2165_v25 = vadd.s32 %v2164_v51, %v2160_v5  ;;  %v1861_v8 = vclz %v2360_v49  ;;  %v2014_v29 = vshrl.u32 %v2013_v19, 5  ;;  %vm2107_vm5 = vcmp.lt.s32.totalorder %v3582_v52, 0 }
 0x4cc   :  { %v2016_v63 = vsub.s32 32, %v2015_v22  ;;  %v2009_v18 = vor.u32 8388608, %v2008_v9  ;;  %v2018_v10 = vshll.u32 %v2611_v59, %v2015_v22  ;;  %v2021_v57 = vshll.u32 %v2612_v62, %v2015_v22 }
 0x4cd   :  { %v2166_v14 = vadd.s32 536870912, %v2165_v25  ;;  %v2024_v46 = vshll.u32 %v2613_v0, %v2015_v22  ;;  %vm2366_vm11 = vcmp.lt.s32.totalorder %v2365_v39, 0  ;;  %v2361_v33 = vadd.s32 4294967294, %v1861_v8 }
 0x4ce   :  { %v2019_v45 = vshrl.u32 %v2612_v62, %v2016_v63  ;;  %v2022_v32 = vshrl.u32 %v2613_v0, %v2016_v63  ;;  %v2025_v12 = vshrl.u32 %v2614_v2, %v2016_v63  ;;  %v2028_v35 = vshrl.u32 %v2615_v4, %v2016_v63 }
 0x4cf   :  { %v3709_v16 = vshrl.u32 %v2166_v14, 30  ;;  %v2027_v42 = vshll.u32 %v2614_v2, %v2015_v22  ;;  %v2030_v48 = vshll.u32 %v2615_v4, %v2015_v22  ;;  %v2031_v34 = vshrl.u32 %v2616_v11, %v2016_v63 }
 0x4d0   :  { %v2020_v43 = vor.u32 %v2019_v45, %v2018_v10  ;;  %v2023_v40 = vor.u32 %v2022_v32, %v2021_v57  ;;  %v2026_v50 = vor.u32 %v2025_v12, %v2024_v46  ;;  %v2049_v15 = vshll.u32 %v2009_v18, 8 }
 0x4d1   :  { %v2168_v24 = vshll.u32 %v3709_v16, 30  ;;  %v2029_v26 = vor.u32 %v2028_v35, %v2027_v42  ;;  %v3718_v0 = vsel %vm2366_vm11, 0, %v2365_v39  ;;  %v2032_v53 = vor.u32 %v2031_v34, %v2030_v48 }
 0x4d2   :  { %vm2033_vm13 = vcmp.lt.s32.totalorder %v2014_v29, 1  ;;  %vm2036_vm14 = vcmp.lt.s32.totalorder %v2014_v29, 4  ;;  %vm2362_vm15 = vcmp.lt.s32.totalorder %v2361_v33, 0  ;;  %v2017_v7 = vshrl.u32 %v2611_v59, %v2016_v63 }
 0x4d3   :  { %v2169_v62 = vsub.s32 %v2165_v25, %v2168_v24  ;;  %v2038_v2 = vsel %vm2036_vm14, %v2026_v50, 2102212464  ;;  %v2041_v20 = vsel %vm2033_vm13, %v2020_v43, %v2023_v40  ;;  %vm2035_vm0 = vcmp.lt.s32.totalorder %v2014_v29, 3 }
 0x4d4   :  { %v2042_v1 = vsel %vm2036_vm14, %v2029_v26, 920167782  ;;  %v2045_v44 = vsel %vm2033_vm13, %v2023_v40, %v2026_v50  ;;  %vm2034_vm1 = vcmp.lt.s32.totalorder %v2014_v29, 2  ;;  %v2046_v11 = vsel %vm2036_vm14, %v2032_v53, 1326507024 }
 0x4d5   :  { %v2171_v36 = vsub.s32 0, %v2169_v62  ;;  %v2043_v4 = vsel %vm2035_vm0, %v2026_v50, %v2042_v1  ;;  %v2037_v17 = vsel %vm2033_vm13, %v2017_v7, %v2020_v43  ;;  %v2039_v22 = vsel %vm2035_vm0, %v2023_v40, %v2038_v2 }
 0x4d6   :  { %v2044_v3 = vsel %vm2034_vm1, %v2041_v20, %v2043_v4  ;;  %v2047_v49 = vsel %vm2035_vm0, %v2029_v26, %v2046_v11  ;;  %v1864_v39 = vsel %vm2362_vm15, 0, %v2361_v33  ;;  %v2040_v14 = vsel %vm2034_vm1, %v2037_v17, %v2039_v22 }
 0x4d7   :  { %v2372_v19 = vmin.u32 %v2171_v36, %v2169_v62  ;;  %v2048_v51 = vsel %vm2034_vm1, %v2045_v44, %v2047_v49  ;;  %v3721_v9 = vmul.u32.u64.low %v2049_v15, %v2044_v3  ;;  %v3722_v25 = vmul.u32.u64.high %v2049_v15, %v2044_v3, %v3721_v9 }
 0x4d8   :  { %v3726_v59 = vmul.u32.u64.low %v2049_v15, %v2048_v51  ;;  %v3727_v63 = vmul.u32.u64.high %v2049_v15, %v2048_v51, %v3726_v59  ;;  %v1973_v45 = vsub.s32 4294967266, %v3718_v0  ;;  %v1869_v32 = vsub.s32 4294967266, %v1864_v39 }
 0x4d9   :  { %v2173_v5 = vclz %v2372_v19  ;;  %v2059_v18 = vadd.s32 1, %v3722_v25  ;;  %v2056_v12 = vmul.u32 %v2049_v15, %v2040_v14  ;;  %v2161_v57 = vadd.s32 %v3687_v31, %v3694_v47 }
 0x4da   :  { %vm2058_vm4 = vc.u32 %v3727_v63, %v3721_v9  ;;  %v1974_v29 = vadd.s32 127, %v1973_v45  ;;  %v1870_v24 = vadd.s32 127, %v1869_v32  ;;  %v1969_v26 = vsub.s32 32, %v3718_v0 }
 0x4db   :  { %v2373_v8 = vadd.s32 4294967294, %v2173_v5  ;;  %v2060_v33 = vsel %vm2058_vm4, %v2059_v18, %v3722_v25  ;;  %v1865_v34 = vsub.s32 32, %v1864_v39  ;;  %v1953_v36 = vadd.s32 %v3621_v41, %v3618_v27 }
 0x4dc   :  { %v2061_v42 = vadd.s32 %v2060_v33, %v2056_v12  ;;  %v1975_v31 = vshll.u32 %v1974_v29, 23  ;;  %v1849_v2 = vadd.s32 %v3643_v61, %v3652_v58  ;;  %v1871_v20 = vshll.u32 %v1870_v24, 23 }
 0x4dd   :  { %vm2374_vm2 = vcmp.lt.s32.totalorder %v2373_v8, 0  ;;  %v1970_v11 = vshll.u32 %v3662_v56, %v3718_v0  ;;  %v1866_v27 = vshll.u32 %v3681_v38, %v1864_v39  ;;  %v2191_v59 = vsub.s32 4, %v3709_v16 }
 0x4de   :  { %v2176_v10 = vsel %vm2374_vm2, 0, %v2373_v8  ;;  %v2062_v48 = vadd.s32 536870912, %v2061_v42  ;;  %v1867_v44 = vshrl.u32 %v1849_v2, %v1865_v34  ;;  %v1976_v17 = vor.u32 4788187, %v1975_v31 }
 0x4df   :  { %v2177_v46 = vsub.s32 32, %v2176_v10  ;;  %v2181_v35 = vsub.s32 4294967266, %v2176_v10  ;;  %v2178_v43 = vshll.u32 %v2169_v62, %v2176_v10  ;;  %v1971_v62 = vshrl.u32 %v1953_v36, %v1969_v26 }
 0x4e0   :  { %v3740_v47 = vshrl.u32 %v2062_v48, 30  ;;  %v1872_v41 = vor.u32 4788187, %v1871_v20  ;;  %v1868_v61 = vor.u32 %v1867_v44, %v1866_v27  ;;  %v1977_v51 = vand.u32 2147483647, %v1976_v17 }
 0x4e1   :  { %v2179_v40 = vshrl.u32 %v2161_v57, %v2177_v46  ;;  %v2182_v50 = vadd.s32 127, %v2181_v35  ;;  %v1972_v49 = vor.u32 %v1971_v62, %v1970_v11  ;;  %vm3752_vm6 = vcmp.le.f32.partialorder %v2105_v30, 0.7853982 }
 0x4e2   :  { %v2064_v1 = vshll.u32 %v3740_v47, 30  ;;  %v1873_v8 = vand.u32 2147483647, %v1872_v41  ;;  %v1875_v45 = vcvt.s32.f32 %v1868_v61  ;;  %v2192_v10 = vsel %vm2107_vm5, %v2191_v59, %v3709_v16 }
 0x4e3   :  { %v2180_v15 = vor.u32 %v2179_v40, %v2178_v43  ;;  %v2183_v53 = vshll.u32 %v2182_v50, 23  ;;  %v1979_v0 = vcvt.s32.f32 %v1972_v49  ;;  %v2194_v57 = vsel %vm3752_vm6, 0, %v2192_v10 }
 0x4e4   :  { %v2065_v22 = vsub.s32 %v2061_v42, %v2064_v1  ;;  %v1876_v12 = vmul.f32 %v1875_v45, %v1873_v8  ;;  %v2057_v35 = vadd.s32 %v3721_v9, %v3727_v63  ;;  %v2198_v50 = vadd.s32 3, %v2194_v57  ;;  %v2209_v9 = vld [vmem:[%s3843_s9] sm:$0xff] }
 0x4e5   :  { %v2184_v7 = vor.u32 4788187, %v2183_v53  ;;  %v2187_v4 = vcvt.s32.f32 %v2180_v15  ;;  %v1980_v32 = vmul.f32 %v1979_v0, %v1977_v51  ;;  %vm1899_vm7 = vcmp.lt.s32.totalorder %v3572_v6, 0 }
 0x4e6   :  { %v2067_v5 = vsub.s32 0, %v2065_v22  ;;  %v1877_v42 = vxor.u32 2147483648, %v1876_v12  ;;  %vm1795_vm8 = vcmp.lt.s32.totalorder %v3576_v37, 0  ;;  %vm3770_vm10 = vcmp.le.f32.partialorder %v1897_v60, 0.7853982 }
 0x4e7   :  { %v2185_v19 = vand.u32 2147483647, %v2184_v7  ;;  %v1981_v46 = vxor.u32 2147483648, %v1980_v32  ;;  %v2199_v15 = vand.u32 3, %v2198_v50  ;;  %vm3781_vm11 = vcmp.le.f32.partialorder %v1793_v21, 0.7853982 }
 0x4e8   :  { %v2368_v25 = vmin.u32 %v2067_v5, %v2065_v22  ;;  %v1878_v63 = vsel %vm1795_vm8, %v1877_v42, %v1876_v12  ;;  %vm2003_vm13 = vcmp.lt.s32.totalorder %v3587_v23, 0  ;;  %vm2197_vm1 = vweird.f32 %v3582_v52 }
 0x4e9   :  { %v2188_v3 = vmul.f32 %v2187_v4, %v2185_v19  ;;  %v1982_v16 = vsel %vm1899_vm7, %v1981_v46, %v1980_v32  ;;  %v1881_v7 = vsel %vm3781_vm11, %v3576_v37, %v1878_v63  ;;  %vm2204_vm14 = vcmp.eq.s32.totalorder %v2199_v15, 2  ;;  %v2214_v63 = vpop.permute.xlu0 %2213 }
 0x4ea   :  { %v2069_v14 = vclz %v2368_v25  ;;  %v1985_v53 = vsel %vm3770_vm10, %v3572_v6, %v1982_v16  ;;  %vm2201_vm15 = vcmp.eq.s32.totalorder %v2199_v15, 0  ;;  %v1983_v19 = vsub.s32 4, %v3648_v13 }
 0x4eb   :  { %v2189_v58 = vxor.u32 2147483648, %v2188_v3  ;;  %vm2200_vm0 = vcmp.lt.s32.totalorder %v2199_v15, 2  ;;  %vm3794_vm2 = vcmp.le.f32.partialorder %v2001_v55, 0.7853982  ;;  %v1879_v49 = vsub.s32 4, %v3675_v54 }
 0x4ec   :  { %v2369_v18 = vadd.s32 4294967294, %v2069_v14 }
 0x4ed   :  { %v2190_v38 = vsel %vm2107_vm5, %v2189_v58, %v2188_v3  ;;  %v1880_v61 = vsel %vm1795_vm8, %v1879_v49, %v3675_v54 }
 0x4ee   :  { %v2193_v39 = vsel %vm3752_vm6, %v3582_v52, %v2190_v38  ;;  %vm2370_vm9 = vcmp.lt.s32.totalorder %v2369_v18, 0  ;;  %v1984_v52 = vsel %vm1899_vm7, %v1983_v19, %v3648_v13  ;;  %v1882_v25 = vsel %vm3781_vm11, 0, %v1880_v61 }
 0x4ef   :  { %2594 = vcosq.f32 %v2193_v39  ;;  %v2072_v30 = vsel %vm2370_vm9, 0, %v2369_v18  ;;  %v1986_v58 = vsel %vm3770_vm10, 0, %v1984_v52  ;;  %v1886_v38 = vadd.s32 3, %v1882_v25 }
 0x4f0   :  { %2596 = vsinq.f32 %v2193_v39  ;;  %v2073_v33 = vsub.s32 32, %v2072_v30  ;;  %v2077_v29 = vsub.s32 4294967266, %v2072_v30  ;;  %v2074_v24 = vshll.u32 %v2065_v22, %v2072_v30 }
 0x4f1   :  { %2598 = vcosq.f32 %v1985_v53  ;;  %v2087_v22 = vsub.s32 4, %v3740_v47  ;;  %v1990_v59 = vadd.s32 3, %v1986_v58  ;;  %v1887_v32 = vand.u32 3, %v1886_v38 }
 0x4f2   :  { %v2075_v43 = vshrl.u32 %v2057_v35, %v2073_v33  ;;  %v2078_v40 = vadd.s32 127, %v2077_v29  ;;  %2600 = vsinq.f32 %v1985_v53  ;;  %vm2093_vm11 = vweird.f32 %v3587_v23 }
 0x4f3   :  { %2602 = vcosq.f32 %v1881_v7  ;;  %v2088_v55 = vsel %vm2003_vm13, %v2087_v22, %v3740_v47  ;;  %v1991_v39 = vand.u32 3, %v1990_v59  ;;  %vm1889_vm7 = vcmp.eq.s32.totalorder %v1887_v32, 0 }
 0x4f4   :  { %v2076_v26 = vor.u32 %v2075_v43, %v2074_v24  ;;  %v2079_v48 = vshll.u32 %v2078_v40, 23  ;;  %2604 = vsinq.f32 %v1881_v7  ;;  %v2090_v51 = vsel %vm3794_vm2, 0, %v2088_v55 }
 0x4f5   :  { %v2094_v8 = vadd.s32 3, %v2090_v51  ;;  %vm1992_vm3 = vcmp.lt.s32.totalorder %v1991_v39, 2  ;;  %vm1993_vm4 = vcmp.eq.s32.totalorder %v1991_v39, 0  ;;  %vm1996_vm5 = vcmp.eq.s32.totalorder %v1991_v39, 2 }
 0x4f6   :  { %v2080_v34 = vor.u32 4788187, %v2079_v48  ;;  %v2083_v2 = vcvt.s32.f32 %v2076_v26  ;;  %vm1892_vm8 = vcmp.eq.s32.totalorder %v1887_v32, 2 }
 0x4f7   :  { %v2095_v14 = vand.u32 3, %v2094_v8 }
 0x4f8   :  { %v2081_v60 = vand.u32 2147483647, %v2080_v34 }
 0x4f9   :  { %vm2100_vm6 = vcmp.eq.s32.totalorder %v2095_v14, 2  ;;  %vm2097_vm9 = vcmp.eq.s32.totalorder %v2095_v14, 0  ;;  %vm2096_vm10 = vcmp.lt.s32.totalorder %v2095_v14, 2 }
 0x4fa   :  { %v2084_v1 = vmul.f32 %v2083_v2, %v2081_v60 }
 0x4fc   :  { %v2595_v36 = vpop.eup %2594  ;;  %v2085_v4 = vxor.u32 2147483648, %v2084_v1 }
 0x4fd   :  { %v2597_v20 = vpop.eup %2596  ;;  %v2205_v62 = vxor.u32 2147483648, %v2595_v36 }
 0x4fe   :  { %v2202_v44 = vxor.u32 2147483648, %v2597_v20  ;;  %v2086_v41 = vsel %vm2003_vm13, %v2085_v4, %v2084_v1  ;;  %v2599_v13 = vpop.eup %2598  ;;  %vm1888_vm13 = vcmp.lt.s32.totalorder %v1887_v32, 2 }
 0x4ff   :  { %v2206_v21 = vsel %vm2204_vm14, %v2205_v62, %v2597_v20  ;;  %v2089_v5 = vsel %vm3794_vm2, %v3587_v23, %v2086_v41  ;;  %v2601_v56 = vpop.eup %2600  ;;  %v1997_v54 = vxor.u32 2147483648, %v2599_v13  ;;  %vm1989_vm14 = vweird.f32 %v3572_v6 }
 0x500   :  { %v2203_v11 = vsel %vm2201_vm15, %v2595_v36, %v2202_v44  ;;  %2606 = vcosq.f32 %v2089_v5  ;;  %v2603_v0 = vpop.eup %2602  ;;  %v1994_v45 = vxor.u32 2147483648, %v2601_v56  ;;  %vm1885_vm15 = vweird.f32 %v3576_v37 }
 0x501   :  { %v2207_v17 = vsel %vm2200_vm0, %v2203_v11, %v2206_v21  ;;  %2608 = vsinq.f32 %v2089_v5  ;;  %v2605_v47 = vpop.eup %2604  ;;  %v1893_v12 = vxor.u32 2147483648, %v2603_v0  ;;  %v1998_v33 = vsel %vm1996_vm5, %v1997_v54, %v2601_v56 }
 0x502   :  { %v2208_v3 = vsel %vm2197_vm1, nan, %v2207_v17  ;;  %v1890_v10 = vxor.u32 2147483648, %v2605_v47  ;;  %v1995_v35 = vsel %vm1993_vm4, %v2599_v13, %v1994_v45 }
 0x503   :  { %2461 = vmatpush3.msra.mxu0 %v2208_v3  ;;  %v1894_v43 = vsel %vm1892_vm8, %v1893_v12, %v2605_v47  ;;  %v1999_v50 = vsel %vm1992_vm3, %v1995_v35, %v1998_v33 }
 0x504   :  { %2462 = vmatprep.subr.mxu0 %v2617_v28  ;;  %v1891_v24 = vsel %vm1889_vm7, %v2603_v0, %v1890_v10  ;;  %v2000_v48 = vsel %vm1989_vm14, nan, %v1999_v50 }
 0x505   :  { %v1895_v26 = vsel %vm1888_vm13, %v1891_v24, %v1894_v43 }
 0x506   :  { %v1896_v23 = vsel %vm1885_vm15, nan, %v1895_v26 }
 0x50d   :  { %v2607_v18 = vpop.eup %2606 }
 0x50e   :  { %v2609_v30 = vpop.eup %2608  ;;  %v2101_v57 = vxor.u32 2147483648, %v2607_v18 }
 0x50f   :  { %v2098_v46 = vxor.u32 2147483648, %v2609_v30 }
 0x510   :  { %v2102_v29 = vsel %vm2100_vm6, %v2101_v57, %v2609_v30 }
 0x511   :  { %v2099_v42 = vsel %vm2097_vm9, %v2607_v18, %v2098_v46 }
 0x512   :  { %v2103_v40 = vsel %vm2096_vm10, %v2099_v42, %v2102_v29 }
 0x513   :  { %v2104_v16 = vsel %vm2093_vm11, nan, %v2103_v40 }
 0x514   :  { %2463 = vmatpush3.msra.mxu0 %v2104_v16 }
 0x515   :  { %2464 = vmatprep.subr.mxu0 %v2617_v28 }
 0x516   :  { %2465 = vmatpush3.msra.mxu0 %v2000_v48 }
 0x517   :  { %2466 = vmatprep.subr.mxu0 %v2617_v28 }
 0x518   :  { %2467 = vmatpush3.msra.mxu0 %v1896_v23 }
 0x519   :  { %2469 = vmatmul.mubr.msk.f32.vlgmr.msra.gmra.mxu0 %vm613_vm12, %v2209_v9 }
 0x5d9   :  { %v2285_v34 = vpop.f32.mrf.mxu0 }
 0x5da   :  { %v2286_v6 = vadd.f32 %v2285_v34, %v2214_v63 }
 0x5db   :  { %v2470_v15 = vpop.f32.mrf.mxu0 }
 0x5dc   :  { %2289 = vst [vmem:[%s3844_s11] sm:$0xff] %v2286_v6 }

</bundles_post_ra>
